<compile_context>
chip_gen: v6e
topology: v6e:2x2x1
jax: 0.10.0
libtpu: 0.0.40
codegen_flags: <defaults>
</compile_context>

<pallas_src>
import jax
import jax.numpy as jnp
from jax import lax
from jax.experimental import pallas as pl
from jax.experimental.pallas import tpu as pltpu

NEG_SLOPE = 0.01  # nn.LeakyReLU() default


def _gru_decoder_kernel(x_ref, w_ih_ref, w_hh_ref, b_rz_ref, b_in_ref, b_hn_ref,
                        w_dec_ref, b_dec_ref,
                        out_ref, hN_ref,
                        h_scratch, hs_scratch):
    c = pl.program_id(0)
    B, Tc, V = x_ref.shape
    H = h_scratch.shape[-1]

    # hidden=None in the torch forward -> zero initial state
    @pl.when(c == 0)
    def _():
        h_scratch[...] = jnp.zeros_like(h_scratch)

    # loop-invariant loads / broadcasts (hoisted out of the time loop)
    w_hh = w_hh_ref[...]                                   # (H, 3H)
    b_rz = jnp.broadcast_to(b_rz_ref[...], (B, 2 * H))     # b_ih+b_hh for r,z
    b_in = jnp.broadcast_to(b_in_ref[...], (B, H))         # b_ih for n
    b_hn = jnp.broadcast_to(b_hn_ref[...], (B, H))         # b_hh for n (stays inside r*(...))

    # input projection batched over the whole chunk: one MXU matmul
    x2 = x_ref[...].reshape(B * Tc, V)
    gi_all = jnp.dot(x2, w_ih_ref[...],
                     preferred_element_type=jnp.float32).reshape(B, Tc, 3 * H)

    h = h_scratch[...]                                     # (B, H)
    for t in range(Tc):     # Tc small & static -> fully unrolled recurrence
        gi = gi_all[:, t, :]                               # (B, 3H) static slice
        gh = jnp.dot(h, w_hh, preferred_element_type=jnp.float32)
        rz = jax.nn.sigmoid(gi[:, :2 * H] + gh[:, :2 * H] + b_rz)
        r = rz[:, :H]
        z = rz[:, H:]
        n = jnp.tanh(gi[:, 2 * H:] + b_in + r * (gh[:, 2 * H:] + b_hn))
        h = (1.0 - z) * n + z * h
        hs_scratch[:, t, :] = h                            # (B, H) at static offset t

    h_scratch[...] = h

    # final-hidden output: written once, on the last chunk only
    @pl.when(c == pl.num_programs(0) - 1)
    def _():
        hN_ref[...] = h

    # decoder + LeakyReLU batched over the chunk; single store per chunk
    hs = hs_scratch[...].reshape(B * Tc, H)
    dec = jnp.dot(hs, w_dec_ref[...],
                  preferred_element_type=jnp.float32) + b_dec_ref[...]
    out_ref[...] = jnp.where(dec >= 0.0, dec, NEG_SLOPE * dec).reshape(B, Tc, V)


def single_note_rnn_forward(data, params, *, time_chunk=8):
    """data: (B, T, V) float32 (batch_first, like the torch module).
    Returns (output (B, T, V), hidden (1, B, H))."""
    B, T, V = data.shape
    H = params["w_hh"].shape[1]

    # time chunk: a multiple of 8 keeps all in-kernel reshapes layout-free.
    # (For v7x's 64 MiB VMEM, larger shapes would size Tc to keep
    #  2x(B,Tc,V) in + 2x(B,Tc,V) out + weights + (B,Tc,H) scratch resident.)
    Tc = time_chunk if (time_chunk <= T and T % time_chunk == 0) else T
    num_chunks = T // Tc

    # pre-transposed weights: kernel contracts on the last dim, no in-kernel .T
    w_ih_t = params["w_ih"].T          # (V, 3H)
    w_hh_t = params["w_hh"].T          # (H, 3H)
    w_dec_t = params["w_dec"].T        # (H, V)
    # folded biases: b_ih+b_hh for r,z; the n gate keeps b_in / b_hn separate
    b_rz = (params["b_ih"][:2 * H] + params["b_hh"][:2 * H]).reshape(1, 2 * H)
    b_in = params["b_ih"][2 * H:].reshape(1, H)
    b_hn = params["b_hh"][2 * H:].reshape(1, H)
    b_dec = params["b_dec"].reshape(1, V)

    # NOTE: constant-index weight/bias specs could be marked
    # pipeline_mode=pl.Buffered(1) to skip double-buffering; they total a few
    # KiB here so the default is kept for lowering simplicity.
    const = lambda c: (0, 0)

    out, h_last = pl.pallas_call(
        _gru_decoder_kernel,
        out_shape=(jax.ShapeDtypeStruct((B, T, V), jnp.float32),
                   jax.ShapeDtypeStruct((B, H), jnp.float32)),
        grid_spec=pltpu.PrefetchScalarGridSpec(
            num_scalar_prefetch=0,
            grid=(num_chunks,),
            in_specs=[
                pl.BlockSpec((B, Tc, V), lambda c: (0, c, 0)),   # x chunk (batch-first)
                pl.BlockSpec((V, 3 * H), const),                 # W_ih^T
                pl.BlockSpec((H, 3 * H), const),                 # W_hh^T
                pl.BlockSpec((1, 2 * H), const),                 # folded b_r,z
                pl.BlockSpec((1, H), const),                     # b_in
                pl.BlockSpec((1, H), const),                     # b_hn
                pl.BlockSpec((H, V), const),                     # W_dec^T
                pl.BlockSpec((1, V), const),                     # b_dec
            ],
            out_specs=[
                pl.BlockSpec((B, Tc, V), lambda c: (0, c, 0)),   # output chunk
                pl.BlockSpec((B, H), const),                     # final hidden
            ],
            scratch_shapes=[
                pltpu.VMEM((B, H), jnp.float32),       # carried hidden state
                pltpu.VMEM((B, Tc, H), jnp.float32),   # per-chunk hidden states
            ],
        ),
        compiler_params=pltpu.CompilerParams(
            dimension_semantics=("arbitrary",)),       # time chunks are sequential
    )(data, w_ih_t, w_hh_t, b_rz, b_in, b_hn, w_dec_t, b_dec)

    return out, h_last[None, :, :]


def init_params(key, hidden_size, vocab_size):
    """Deterministic init mirroring PyTorch's U(-1/sqrt(H), 1/sqrt(H))."""
    H, V = hidden_size, vocab_size
    k = 1.0 / jnp.sqrt(jnp.float32(H))
    keys = jax.random.split(key, 6)
    u = lambda kk, shape: jax.random.uniform(kk, shape, jnp.float32, -k, k)
    return {
        "w_ih": u(keys[0], (3 * H, V)),
        "w_hh": u(keys[1], (3 * H, H)),
        "b_ih": u(keys[2], (3 * H,)),
        "b_hh": u(keys[3], (3 * H,)),
        "w_dec": u(keys[4], (V, H)),
        "b_dec": u(keys[5], (V,)),
    }


def reference_forward(data, params):
    """Pure-JAX reference of the torch forward (GRU -> Linear -> LeakyReLU)."""
    B, T, V = data.shape
    H = params["w_hh"].shape[1]
    h0 = jnp.zeros((B, H), jnp.float32)

    def step(h, x_t):
        gi = x_t @ params["w_ih"].T + params["b_ih"]
        gh = h @ params["w_hh"].T + params["b_hh"]
        r = jax.nn.sigmoid(gi[:, :H] + gh[:, :H])
        z = jax.nn.sigmoid(gi[:, H:2 * H] + gh[:, H:2 * H])
        n = jnp.tanh(gi[:, 2 * H:] + r * gh[:, 2 * H:])
        h_new = (1.0 - z) * n + z * h
        return h_new, h_new

    h_last, hs = lax.scan(step, h0, jnp.transpose(data, (1, 0, 2)))
    hs = jnp.transpose(hs, (1, 0, 2))               # (B, T, H)
    dec = hs @ params["w_dec"].T + params["b_dec"]
    out = jnp.where(dec >= 0.0, dec, NEG_SLOPE * dec)
    return out, h_last[None]


if __name__ == "__main__":
    B, T, V, H = 2, 32, 26, 32   # 4 time-chunks of 8 -> exercises chunk carry

    key = jax.random.PRNGKey(0)
    k_data, k_param = jax.random.split(key)
    data = jax.random.normal(k_data, (B, T, V), jnp.float32)
    params = init_params(k_param, H, V)

    out, hidden = single_note_rnn_forward(data, params, time_chunk=8)
    out, hidden = jax.block_until_ready((out, hidden))

    ref_out, ref_hidden = reference_forward(data, params)
    assert out.shape == (B, T, V) and hidden.shape == (1, B, H)
    assert jnp.allclose(out, ref_out, atol=1e-4, rtol=1e-4)
    assert jnp.allclose(hidden, ref_hidden, atol=1e-4, rtol=1e-4)

    print("KERNEL_OK")
</pallas_src>

<mosaic_0001>
module attributes {stable_mosaic.version = 11 : i64} {
  func.func @_gru_decoder_kernel(%arg0: i32, %arg1: memref<2x8x26xf32, #tpu.memory_space<vmem>>, %arg2: memref<26x96xf32, #tpu.memory_space<vmem>>, %arg3: memref<32x96xf32, #tpu.memory_space<vmem>>, %arg4: memref<1x64xf32, #tpu.memory_space<vmem>>, %arg5: memref<1x32xf32, #tpu.memory_space<vmem>>, %arg6: memref<1x32xf32, #tpu.memory_space<vmem>>, %arg7: memref<32x26xf32, #tpu.memory_space<vmem>>, %arg8: memref<1x26xf32, #tpu.memory_space<vmem>>, %arg9: memref<2x8x26xf32, #tpu.memory_space<vmem>>, %arg10: memref<2x32xf32, #tpu.memory_space<vmem>>, %arg11: memref<2x32xf32, #tpu.memory_space<vmem>>, %arg12: memref<2x8x32xf32, #tpu.memory_space<vmem>>) attributes {dimension_semantics = [#tpu.dimension_semantics<arbitrary>], iteration_bounds = array<i64: 4>, scalar_prefetch = 0 : i64, scratch_operands = 2 : i64, tpu.core_type = #tpu.core_type<tc>, window_params = [{transform_indices = @transform_0, window_bounds = array<i64: 2, 8, 26>}, {pipeline_mode = #tpu.pipeline_mode<synchronous>, transform_indices = @transform_1, window_bounds = array<i64: 26, 96>}, {pipeline_mode = #tpu.pipeline_mode<synchronous>, transform_indices = @transform_2, window_bounds = array<i64: 32, 96>}, {pipeline_mode = #tpu.pipeline_mode<synchronous>, transform_indices = @transform_3, window_bounds = array<i64: 1, 64>}, {pipeline_mode = #tpu.pipeline_mode<synchronous>, transform_indices = @transform_4, window_bounds = array<i64: 1, 32>}, {pipeline_mode = #tpu.pipeline_mode<synchronous>, transform_indices = @transform_5, window_bounds = array<i64: 1, 32>}, {pipeline_mode = #tpu.pipeline_mode<synchronous>, transform_indices = @transform_6, window_bounds = array<i64: 32, 26>}, {pipeline_mode = #tpu.pipeline_mode<synchronous>, transform_indices = @transform_7, window_bounds = array<i64: 1, 26>}, {transform_indices = @transform_8, window_bounds = array<i64: 2, 8, 26>}, {pipeline_mode = #tpu.pipeline_mode<synchronous>, transform_indices = @transform_9, window_bounds = array<i64: 2, 32>}]} {
    %c0_i32 = arith.constant 0 : i32
    %0 = arith.cmpi eq, %arg0, %c0_i32 : i32
    %1 = arith.extui %0 : i1 to i32
    %c0_i32_0 = arith.constant 0 : i32
    %2 = arith.cmpi ne, %1, %c0_i32_0 : i32
    scf.if %2 {
      %cst_72 = arith.constant 0.000000e+00 : f32
      %269 = vector.broadcast %cst_72 : f32 to vector<2x32xf32>
      %c0_73 = arith.constant 0 : index
      %c0_74 = arith.constant 0 : index
      %270 = vector.load %arg11[%c0_73, %c0_74] : memref<2x32xf32, #tpu.memory_space<vmem>>, vector<2x32xf32>
      tpu.vector_store %arg11[%c0_73, %c0_74], %269 {strides = array<i32>} : memref<2x32xf32, #tpu.memory_space<vmem>>, vector<2x32xf32>,
    } else {
    }
    %c0 = arith.constant 0 : index
    %c0_1 = arith.constant 0 : index
    %3 = vector.load %arg3[%c0, %c0_1] : memref<32x96xf32, #tpu.memory_space<vmem>>, vector<32x96xf32>
    %c0_2 = arith.constant 0 : index
    %c0_3 = arith.constant 0 : index
    %4 = vector.load %arg4[%c0_2, %c0_3] : memref<1x64xf32, #tpu.memory_space<vmem>>, vector<1x64xf32>
    %5 = vector.shape_cast %4 : vector<1x64xf32> to vector<1x64xf32>
    %6 = vector.broadcast %5 : vector<1x64xf32> to vector<2x64xf32>
    %c0_4 = arith.constant 0 : index
    %c0_5 = arith.constant 0 : index
    %7 = vector.load %arg5[%c0_4, %c0_5] : memref<1x32xf32, #tpu.memory_space<vmem>>, vector<1x32xf32>
    %8 = vector.shape_cast %7 : vector<1x32xf32> to vector<1x32xf32>
    %9 = vector.broadcast %8 : vector<1x32xf32> to vector<2x32xf32>
    %c0_6 = arith.constant 0 : index
    %c0_7 = arith.constant 0 : index
    %10 = vector.load %arg6[%c0_6, %c0_7] : memref<1x32xf32, #tpu.memory_space<vmem>>, vector<1x32xf32>
    %11 = vector.shape_cast %10 : vector<1x32xf32> to vector<1x32xf32>
    %12 = vector.broadcast %11 : vector<1x32xf32> to vector<2x32xf32>
    %c0_8 = arith.constant 0 : index
    %c0_9 = arith.constant 0 : index
    %c0_10 = arith.constant 0 : index
    %13 = vector.load %arg1[%c0_8, %c0_9, %c0_10] : memref<2x8x26xf32, #tpu.memory_space<vmem>>, vector<2x8x26xf32>
    %14 = vector.shape_cast %13 : vector<2x8x26xf32> to vector<16x26xf32>
    %c0_11 = arith.constant 0 : index
    %c0_12 = arith.constant 0 : index
    %15 = vector.load %arg2[%c0_11, %c0_12] : memref<26x96xf32, #tpu.memory_space<vmem>>, vector<26x96xf32>
    %cst = arith.constant dense<0.000000e+00> : vector<16x96xf32>
    %16 = tpu.matmul %14, %15, %cst {dimension_numbers = #tpu.dot_dimension_numbers<[1], [0], [0], [1], [0, 0, 1, 1], [], []>} : vector<16x26xf32>, vector<26x96xf32>, vector<16x96xf32> -> vector<16x96xf32>
    %17 = vector.shape_cast %16 : vector<16x96xf32> to vector<2x8x96xf32>
    %c0_13 = arith.constant 0 : index
    %c0_14 = arith.constant 0 : index
    %18 = vector.load %arg11[%c0_13, %c0_14] : memref<2x32xf32, #tpu.memory_space<vmem>>, vector<2x32xf32>
    %19 = vector.extract_strided_slice %17 {offsets = [0, 0, 0], sizes = [2, 1, 96], strides = [1, 1, 1]} : vector<2x8x96xf32> to vector<2x1x96xf32>
    %20 = vector.shape_cast %19 : vector<2x1x96xf32> to vector<2x96xf32>
    %cst_15 = arith.constant dense<0.000000e+00> : vector<2x96xf32>
    %21 = tpu.matmul %18, %3, %cst_15 {dimension_numbers = #tpu.dot_dimension_numbers<[1], [0], [0], [1], [0, 0, 1, 1], [], []>} : vector<2x32xf32>, vector<32x96xf32>, vector<2x96xf32> -> vector<2x96xf32>
    %22 = vector.extract_strided_slice %20 {offsets = [0, 0], sizes = [2, 64], strides = [1, 1]} : vector<2x96xf32> to vector<2x64xf32>
    %23 = vector.extract_strided_slice %21 {offsets = [0, 0], sizes = [2, 64], strides = [1, 1]} : vector<2x96xf32> to vector<2x64xf32>
    %24 = arith.addf %22, %23 : vector<2x64xf32>
    %25 = arith.addf %24, %6 : vector<2x64xf32>
    %26 = arith.negf %25 : vector<2x64xf32>
    %27 = math.exp %26 : vector<2x64xf32>
    %cst_16 = arith.constant 1.000000e+00 : f32
    %28 = vector.broadcast %cst_16 : f32 to vector<2x64xf32>
    %29 = arith.addf %28, %27 : vector<2x64xf32>
    %30 = arith.divf %28, %29 : vector<2x64xf32>
    %31 = vector.extract_strided_slice %30 {offsets = [0, 0], sizes = [2, 32], strides = [1, 1]} : vector<2x64xf32> to vector<2x32xf32>
    %32 = vector.extract_strided_slice %30 {offsets = [0, 32], sizes = [2, 32], strides = [1, 1]} : vector<2x64xf32> to vector<2x32xf32>
    %33 = vector.extract_strided_slice %20 {offsets = [0, 64], sizes = [2, 32], strides = [1, 1]} : vector<2x96xf32> to vector<2x32xf32>
    %34 = arith.addf %33, %9 : vector<2x32xf32>
    %35 = vector.extract_strided_slice %21 {offsets = [0, 64], sizes = [2, 32], strides = [1, 1]} : vector<2x96xf32> to vector<2x32xf32>
    %36 = arith.addf %35, %12 : vector<2x32xf32>
    %37 = arith.mulf %31, %36 : vector<2x32xf32>
    %38 = arith.addf %34, %37 : vector<2x32xf32>
    %39 = math.tanh %38 : vector<2x32xf32>
    %cst_17 = arith.constant 1.000000e+00 : f32
    %40 = vector.broadcast %cst_17 : f32 to vector<2x32xf32>
    %41 = arith.subf %40, %32 : vector<2x32xf32>
    %42 = arith.mulf %41, %39 : vector<2x32xf32>
    %43 = arith.mulf %32, %18 : vector<2x32xf32>
    %44 = arith.addf %42, %43 : vector<2x32xf32>
    %c0_18 = arith.constant 0 : index
    %c0_19 = arith.constant 0 : index
    %c0_20 = arith.constant 0 : index
    %45 = vector.load %arg12[%c0_18, %c0_19, %c0_20] : memref<2x8x32xf32, #tpu.memory_space<vmem>>, vector<2x1x32xf32>
    %46 = vector.shape_cast %45 : vector<2x1x32xf32> to vector<2x32xf32>
    %47 = vector.shape_cast %44 : vector<2x32xf32> to vector<2x1x32xf32>
    tpu.vector_store %arg12[%c0_18, %c0_19, %c0_20], %47 {strides = array<i32>} : memref<2x8x32xf32, #tpu.memory_space<vmem>>, vector<2x1x32xf32>,
    %48 = vector.extract_strided_slice %17 {offsets = [0, 1, 0], sizes = [2, 1, 96], strides = [1, 1, 1]} : vector<2x8x96xf32> to vector<2x1x96xf32>
    %49 = vector.shape_cast %48 : vector<2x1x96xf32> to vector<2x96xf32>
    %cst_21 = arith.constant dense<0.000000e+00> : vector<2x96xf32>
    %50 = tpu.matmul %44, %3, %cst_21 {dimension_numbers = #tpu.dot_dimension_numbers<[1], [0], [0], [1], [0, 0, 1, 1], [], []>} : vector<2x32xf32>, vector<32x96xf32>, vector<2x96xf32> -> vector<2x96xf32>
    %51 = vector.extract_strided_slice %49 {offsets = [0, 0], sizes = [2, 64], strides = [1, 1]} : vector<2x96xf32> to vector<2x64xf32>
    %52 = vector.extract_strided_slice %50 {offsets = [0, 0], sizes = [2, 64], strides = [1, 1]} : vector<2x96xf32> to vector<2x64xf32>
    %53 = arith.addf %51, %52 : vector<2x64xf32>
    %54 = arith.addf %53, %6 : vector<2x64xf32>
    %55 = arith.negf %54 : vector<2x64xf32>
    %56 = math.exp %55 : vector<2x64xf32>
    %cst_22 = arith.constant 1.000000e+00 : f32
    %57 = vector.broadcast %cst_22 : f32 to vector<2x64xf32>
    %58 = arith.addf %57, %56 : vector<2x64xf32>
    %59 = arith.divf %57, %58 : vector<2x64xf32>
    %60 = vector.extract_strided_slice %59 {offsets = [0, 0], sizes = [2, 32], strides = [1, 1]} : vector<2x64xf32> to vector<2x32xf32>
    %61 = vector.extract_strided_slice %59 {offsets = [0, 32], sizes = [2, 32], strides = [1, 1]} : vector<2x64xf32> to vector<2x32xf32>
    %62 = vector.extract_strided_slice %49 {offsets = [0, 64], sizes = [2, 32], strides = [1, 1]} : vector<2x96xf32> to vector<2x32xf32>
    %63 = arith.addf %62, %9 : vector<2x32xf32>
    %64 = vector.extract_strided_slice %50 {offsets = [0, 64], sizes = [2, 32], strides = [1, 1]} : vector<2x96xf32> to vector<2x32xf32>
    %65 = arith.addf %64, %12 : vector<2x32xf32>
    %66 = arith.mulf %60, %65 : vector<2x32xf32>
    %67 = arith.addf %63, %66 : vector<2x32xf32>
    %68 = math.tanh %67 : vector<2x32xf32>
    %cst_23 = arith.constant 1.000000e+00 : f32
    %69 = vector.broadcast %cst_23 : f32 to vector<2x32xf32>
    %70 = arith.subf %69, %61 : vector<2x32xf32>
    %71 = arith.mulf %70, %68 : vector<2x32xf32>
    %72 = arith.mulf %61, %44 : vector<2x32xf32>
    %73 = arith.addf %71, %72 : vector<2x32xf32>
    %c0_24 = arith.constant 0 : index
    %c1 = arith.constant 1 : index
    %c0_25 = arith.constant 0 : index
    %74 = vector.load %arg12[%c0_24, %c1, %c0_25] : memref<2x8x32xf32, #tpu.memory_space<vmem>>, vector<2x1x32xf32>
    %75 = vector.shape_cast %74 : vector<2x1x32xf32> to vector<2x32xf32>
    %76 = vector.shape_cast %73 : vector<2x32xf32> to vector<2x1x32xf32>
    tpu.vector_store %arg12[%c0_24, %c1, %c0_25], %76 {strides = array<i32>} : memref<2x8x32xf32, #tpu.memory_space<vmem>>, vector<2x1x32xf32>,
    %77 = vector.extract_strided_slice %17 {offsets = [0, 2, 0], sizes = [2, 1, 96], strides = [1, 1, 1]} : vector<2x8x96xf32> to vector<2x1x96xf32>
    %78 = vector.shape_cast %77 : vector<2x1x96xf32> to vector<2x96xf32>
    %cst_26 = arith.constant dense<0.000000e+00> : vector<2x96xf32>
    %79 = tpu.matmul %73, %3, %cst_26 {dimension_numbers = #tpu.dot_dimension_numbers<[1], [0], [0], [1], [0, 0, 1, 1], [], []>} : vector<2x32xf32>, vector<32x96xf32>, vector<2x96xf32> -> vector<2x96xf32>
    %80 = vector.extract_strided_slice %78 {offsets = [0, 0], sizes = [2, 64], strides = [1, 1]} : vector<2x96xf32> to vector<2x64xf32>
    %81 = vector.extract_strided_slice %79 {offsets = [0, 0], sizes = [2, 64], strides = [1, 1]} : vector<2x96xf32> to vector<2x64xf32>
    %82 = arith.addf %80, %81 : vector<2x64xf32>
    %83 = arith.addf %82, %6 : vector<2x64xf32>
    %84 = arith.negf %83 : vector<2x64xf32>
    %85 = math.exp %84 : vector<2x64xf32>
    %cst_27 = arith.constant 1.000000e+00 : f32
    %86 = vector.broadcast %cst_27 : f32 to vector<2x64xf32>
    %87 = arith.addf %86, %85 : vector<2x64xf32>
    %88 = arith.divf %86, %87 : vector<2x64xf32>
    %89 = vector.extract_strided_slice %88 {offsets = [0, 0], sizes = [2, 32], strides = [1, 1]} : vector<2x64xf32> to vector<2x32xf32>
    %90 = vector.extract_strided_slice %88 {offsets = [0, 32], sizes = [2, 32], strides = [1, 1]} : vector<2x64xf32> to vector<2x32xf32>
    %91 = vector.extract_strided_slice %78 {offsets = [0, 64], sizes = [2, 32], strides = [1, 1]} : vector<2x96xf32> to vector<2x32xf32>
    %92 = arith.addf %91, %9 : vector<2x32xf32>
    %93 = vector.extract_strided_slice %79 {offsets = [0, 64], sizes = [2, 32], strides = [1, 1]} : vector<2x96xf32> to vector<2x32xf32>
    %94 = arith.addf %93, %12 : vector<2x32xf32>
    %95 = arith.mulf %89, %94 : vector<2x32xf32>
    %96 = arith.addf %92, %95 : vector<2x32xf32>
    %97 = math.tanh %96 : vector<2x32xf32>
    %cst_28 = arith.constant 1.000000e+00 : f32
    %98 = vector.broadcast %cst_28 : f32 to vector<2x32xf32>
    %99 = arith.subf %98, %90 : vector<2x32xf32>
    %100 = arith.mulf %99, %97 : vector<2x32xf32>
    %101 = arith.mulf %90, %73 : vector<2x32xf32>
    %102 = arith.addf %100, %101 : vector<2x32xf32>
    %c0_29 = arith.constant 0 : index
    %c2 = arith.constant 2 : index
    %c0_30 = arith.constant 0 : index
    %103 = vector.load %arg12[%c0_29, %c2, %c0_30] : memref<2x8x32xf32, #tpu.memory_space<vmem>>, vector<2x1x32xf32>
    %104 = vector.shape_cast %103 : vector<2x1x32xf32> to vector<2x32xf32>
    %105 = vector.shape_cast %102 : vector<2x32xf32> to vector<2x1x32xf32>
    tpu.vector_store %arg12[%c0_29, %c2, %c0_30], %105 {strides = array<i32>} : memref<2x8x32xf32, #tpu.memory_space<vmem>>, vector<2x1x32xf32>,
    %106 = vector.extract_strided_slice %17 {offsets = [0, 3, 0], sizes = [2, 1, 96], strides = [1, 1, 1]} : vector<2x8x96xf32> to vector<2x1x96xf32>
    %107 = vector.shape_cast %106 : vector<2x1x96xf32> to vector<2x96xf32>
    %cst_31 = arith.constant dense<0.000000e+00> : vector<2x96xf32>
    %108 = tpu.matmul %102, %3, %cst_31 {dimension_numbers = #tpu.dot_dimension_numbers<[1], [0], [0], [1], [0, 0, 1, 1], [], []>} : vector<2x32xf32>, vector<32x96xf32>, vector<2x96xf32> -> vector<2x96xf32>
    %109 = vector.extract_strided_slice %107 {offsets = [0, 0], sizes = [2, 64], strides = [1, 1]} : vector<2x96xf32> to vector<2x64xf32>
    %110 = vector.extract_strided_slice %108 {offsets = [0, 0], sizes = [2, 64], strides = [1, 1]} : vector<2x96xf32> to vector<2x64xf32>
    %111 = arith.addf %109, %110 : vector<2x64xf32>
    %112 = arith.addf %111, %6 : vector<2x64xf32>
    %113 = arith.negf %112 : vector<2x64xf32>
    %114 = math.exp %113 : vector<2x64xf32>
    %cst_32 = arith.constant 1.000000e+00 : f32
    %115 = vector.broadcast %cst_32 : f32 to vector<2x64xf32>
    %116 = arith.addf %115, %114 : vector<2x64xf32>
    %117 = arith.divf %115, %116 : vector<2x64xf32>
    %118 = vector.extract_strided_slice %117 {offsets = [0, 0], sizes = [2, 32], strides = [1, 1]} : vector<2x64xf32> to vector<2x32xf32>
    %119 = vector.extract_strided_slice %117 {offsets = [0, 32], sizes = [2, 32], strides = [1, 1]} : vector<2x64xf32> to vector<2x32xf32>
    %120 = vector.extract_strided_slice %107 {offsets = [0, 64], sizes = [2, 32], strides = [1, 1]} : vector<2x96xf32> to vector<2x32xf32>
    %121 = arith.addf %120, %9 : vector<2x32xf32>
    %122 = vector.extract_strided_slice %108 {offsets = [0, 64], sizes = [2, 32], strides = [1, 1]} : vector<2x96xf32> to vector<2x32xf32>
    %123 = arith.addf %122, %12 : vector<2x32xf32>
    %124 = arith.mulf %118, %123 : vector<2x32xf32>
    %125 = arith.addf %121, %124 : vector<2x32xf32>
    %126 = math.tanh %125 : vector<2x32xf32>
    %cst_33 = arith.constant 1.000000e+00 : f32
    %127 = vector.broadcast %cst_33 : f32 to vector<2x32xf32>
    %128 = arith.subf %127, %119 : vector<2x32xf32>
    %129 = arith.mulf %128, %126 : vector<2x32xf32>
    %130 = arith.mulf %119, %102 : vector<2x32xf32>
    %131 = arith.addf %129, %130 : vector<2x32xf32>
    %c0_34 = arith.constant 0 : index
    %c3 = arith.constant 3 : index
    %c0_35 = arith.constant 0 : index
    %132 = vector.load %arg12[%c0_34, %c3, %c0_35] : memref<2x8x32xf32, #tpu.memory_space<vmem>>, vector<2x1x32xf32>
    %133 = vector.shape_cast %132 : vector<2x1x32xf32> to vector<2x32xf32>
    %134 = vector.shape_cast %131 : vector<2x32xf32> to vector<2x1x32xf32>
    tpu.vector_store %arg12[%c0_34, %c3, %c0_35], %134 {strides = array<i32>} : memref<2x8x32xf32, #tpu.memory_space<vmem>>, vector<2x1x32xf32>,
    %135 = vector.extract_strided_slice %17 {offsets = [0, 4, 0], sizes = [2, 1, 96], strides = [1, 1, 1]} : vector<2x8x96xf32> to vector<2x1x96xf32>
    %136 = vector.shape_cast %135 : vector<2x1x96xf32> to vector<2x96xf32>
    %cst_36 = arith.constant dense<0.000000e+00> : vector<2x96xf32>
    %137 = tpu.matmul %131, %3, %cst_36 {dimension_numbers = #tpu.dot_dimension_numbers<[1], [0], [0], [1], [0, 0, 1, 1], [], []>} : vector<2x32xf32>, vector<32x96xf32>, vector<2x96xf32> -> vector<2x96xf32>
    %138 = vector.extract_strided_slice %136 {offsets = [0, 0], sizes = [2, 64], strides = [1, 1]} : vector<2x96xf32> to vector<2x64xf32>
    %139 = vector.extract_strided_slice %137 {offsets = [0, 0], sizes = [2, 64], strides = [1, 1]} : vector<2x96xf32> to vector<2x64xf32>
    %140 = arith.addf %138, %139 : vector<2x64xf32>
    %141 = arith.addf %140, %6 : vector<2x64xf32>
    %142 = arith.negf %141 : vector<2x64xf32>
    %143 = math.exp %142 : vector<2x64xf32>
    %cst_37 = arith.constant 1.000000e+00 : f32
    %144 = vector.broadcast %cst_37 : f32 to vector<2x64xf32>
    %145 = arith.addf %144, %143 : vector<2x64xf32>
    %146 = arith.divf %144, %145 : vector<2x64xf32>
    %147 = vector.extract_strided_slice %146 {offsets = [0, 0], sizes = [2, 32], strides = [1, 1]} : vector<2x64xf32> to vector<2x32xf32>
    %148 = vector.extract_strided_slice %146 {offsets = [0, 32], sizes = [2, 32], strides = [1, 1]} : vector<2x64xf32> to vector<2x32xf32>
    %149 = vector.extract_strided_slice %136 {offsets = [0, 64], sizes = [2, 32], strides = [1, 1]} : vector<2x96xf32> to vector<2x32xf32>
    %150 = arith.addf %149, %9 : vector<2x32xf32>
    %151 = vector.extract_strided_slice %137 {offsets = [0, 64], sizes = [2, 32], strides = [1, 1]} : vector<2x96xf32> to vector<2x32xf32>
    %152 = arith.addf %151, %12 : vector<2x32xf32>
    %153 = arith.mulf %147, %152 : vector<2x32xf32>
    %154 = arith.addf %150, %153 : vector<2x32xf32>
    %155 = math.tanh %154 : vector<2x32xf32>
    %cst_38 = arith.constant 1.000000e+00 : f32
    %156 = vector.broadcast %cst_38 : f32 to vector<2x32xf32>
    %157 = arith.subf %156, %148 : vector<2x32xf32>
    %158 = arith.mulf %157, %155 : vector<2x32xf32>
    %159 = arith.mulf %148, %131 : vector<2x32xf32>
    %160 = arith.addf %158, %159 : vector<2x32xf32>
    %c0_39 = arith.constant 0 : index
    %c4 = arith.constant 4 : index
    %c0_40 = arith.constant 0 : index
    %161 = vector.load %arg12[%c0_39, %c4, %c0_40] : memref<2x8x32xf32, #tpu.memory_space<vmem>>, vector<2x1x32xf32>
    %162 = vector.shape_cast %161 : vector<2x1x32xf32> to vector<2x32xf32>
    %163 = vector.shape_cast %160 : vector<2x32xf32> to vector<2x1x32xf32>
    tpu.vector_store %arg12[%c0_39, %c4, %c0_40], %163 {strides = array<i32>} : memref<2x8x32xf32, #tpu.memory_space<vmem>>, vector<2x1x32xf32>,
    %164 = vector.extract_strided_slice %17 {offsets = [0, 5, 0], sizes = [2, 1, 96], strides = [1, 1, 1]} : vector<2x8x96xf32> to vector<2x1x96xf32>
    %165 = vector.shape_cast %164 : vector<2x1x96xf32> to vector<2x96xf32>
    %cst_41 = arith.constant dense<0.000000e+00> : vector<2x96xf32>
    %166 = tpu.matmul %160, %3, %cst_41 {dimension_numbers = #tpu.dot_dimension_numbers<[1], [0], [0], [1], [0, 0, 1, 1], [], []>} : vector<2x32xf32>, vector<32x96xf32>, vector<2x96xf32> -> vector<2x96xf32>
    %167 = vector.extract_strided_slice %165 {offsets = [0, 0], sizes = [2, 64], strides = [1, 1]} : vector<2x96xf32> to vector<2x64xf32>
    %168 = vector.extract_strided_slice %166 {offsets = [0, 0], sizes = [2, 64], strides = [1, 1]} : vector<2x96xf32> to vector<2x64xf32>
    %169 = arith.addf %167, %168 : vector<2x64xf32>
    %170 = arith.addf %169, %6 : vector<2x64xf32>
    %171 = arith.negf %170 : vector<2x64xf32>
    %172 = math.exp %171 : vector<2x64xf32>
    %cst_42 = arith.constant 1.000000e+00 : f32
    %173 = vector.broadcast %cst_42 : f32 to vector<2x64xf32>
    %174 = arith.addf %173, %172 : vector<2x64xf32>
    %175 = arith.divf %173, %174 : vector<2x64xf32>
    %176 = vector.extract_strided_slice %175 {offsets = [0, 0], sizes = [2, 32], strides = [1, 1]} : vector<2x64xf32> to vector<2x32xf32>
    %177 = vector.extract_strided_slice %175 {offsets = [0, 32], sizes = [2, 32], strides = [1, 1]} : vector<2x64xf32> to vector<2x32xf32>
    %178 = vector.extract_strided_slice %165 {offsets = [0, 64], sizes = [2, 32], strides = [1, 1]} : vector<2x96xf32> to vector<2x32xf32>
    %179 = arith.addf %178, %9 : vector<2x32xf32>
    %180 = vector.extract_strided_slice %166 {offsets = [0, 64], sizes = [2, 32], strides = [1, 1]} : vector<2x96xf32> to vector<2x32xf32>
    %181 = arith.addf %180, %12 : vector<2x32xf32>
    %182 = arith.mulf %176, %181 : vector<2x32xf32>
    %183 = arith.addf %179, %182 : vector<2x32xf32>
    %184 = math.tanh %183 : vector<2x32xf32>
    %cst_43 = arith.constant 1.000000e+00 : f32
    %185 = vector.broadcast %cst_43 : f32 to vector<2x32xf32>
    %186 = arith.subf %185, %177 : vector<2x32xf32>
    %187 = arith.mulf %186, %184 : vector<2x32xf32>
    %188 = arith.mulf %177, %160 : vector<2x32xf32>
    %189 = arith.addf %187, %188 : vector<2x32xf32>
    %c0_44 = arith.constant 0 : index
    %c5 = arith.constant 5 : index
    %c0_45 = arith.constant 0 : index
    %190 = vector.load %arg12[%c0_44, %c5, %c0_45] : memref<2x8x32xf32, #tpu.memory_space<vmem>>, vector<2x1x32xf32>
    %191 = vector.shape_cast %190 : vector<2x1x32xf32> to vector<2x32xf32>
    %192 = vector.shape_cast %189 : vector<2x32xf32> to vector<2x1x32xf32>
    tpu.vector_store %arg12[%c0_44, %c5, %c0_45], %192 {strides = array<i32>} : memref<2x8x32xf32, #tpu.memory_space<vmem>>, vector<2x1x32xf32>,
    %193 = vector.extract_strided_slice %17 {offsets = [0, 6, 0], sizes = [2, 1, 96], strides = [1, 1, 1]} : vector<2x8x96xf32> to vector<2x1x96xf32>
    %194 = vector.shape_cast %193 : vector<2x1x96xf32> to vector<2x96xf32>
    %cst_46 = arith.constant dense<0.000000e+00> : vector<2x96xf32>
    %195 = tpu.matmul %189, %3, %cst_46 {dimension_numbers = #tpu.dot_dimension_numbers<[1], [0], [0], [1], [0, 0, 1, 1], [], []>} : vector<2x32xf32>, vector<32x96xf32>, vector<2x96xf32> -> vector<2x96xf32>
    %196 = vector.extract_strided_slice %194 {offsets = [0, 0], sizes = [2, 64], strides = [1, 1]} : vector<2x96xf32> to vector<2x64xf32>
    %197 = vector.extract_strided_slice %195 {offsets = [0, 0], sizes = [2, 64], strides = [1, 1]} : vector<2x96xf32> to vector<2x64xf32>
    %198 = arith.addf %196, %197 : vector<2x64xf32>
    %199 = arith.addf %198, %6 : vector<2x64xf32>
    %200 = arith.negf %199 : vector<2x64xf32>
    %201 = math.exp %200 : vector<2x64xf32>
    %cst_47 = arith.constant 1.000000e+00 : f32
    %202 = vector.broadcast %cst_47 : f32 to vector<2x64xf32>
    %203 = arith.addf %202, %201 : vector<2x64xf32>
    %204 = arith.divf %202, %203 : vector<2x64xf32>
    %205 = vector.extract_strided_slice %204 {offsets = [0, 0], sizes = [2, 32], strides = [1, 1]} : vector<2x64xf32> to vector<2x32xf32>
    %206 = vector.extract_strided_slice %204 {offsets = [0, 32], sizes = [2, 32], strides = [1, 1]} : vector<2x64xf32> to vector<2x32xf32>
    %207 = vector.extract_strided_slice %194 {offsets = [0, 64], sizes = [2, 32], strides = [1, 1]} : vector<2x96xf32> to vector<2x32xf32>
    %208 = arith.addf %207, %9 : vector<2x32xf32>
    %209 = vector.extract_strided_slice %195 {offsets = [0, 64], sizes = [2, 32], strides = [1, 1]} : vector<2x96xf32> to vector<2x32xf32>
    %210 = arith.addf %209, %12 : vector<2x32xf32>
    %211 = arith.mulf %205, %210 : vector<2x32xf32>
    %212 = arith.addf %208, %211 : vector<2x32xf32>
    %213 = math.tanh %212 : vector<2x32xf32>
    %cst_48 = arith.constant 1.000000e+00 : f32
    %214 = vector.broadcast %cst_48 : f32 to vector<2x32xf32>
    %215 = arith.subf %214, %206 : vector<2x32xf32>
    %216 = arith.mulf %215, %213 : vector<2x32xf32>
    %217 = arith.mulf %206, %189 : vector<2x32xf32>
    %218 = arith.addf %216, %217 : vector<2x32xf32>
    %c0_49 = arith.constant 0 : index
    %c6 = arith.constant 6 : index
    %c0_50 = arith.constant 0 : index
    %219 = vector.load %arg12[%c0_49, %c6, %c0_50] : memref<2x8x32xf32, #tpu.memory_space<vmem>>, vector<2x1x32xf32>
    %220 = vector.shape_cast %219 : vector<2x1x32xf32> to vector<2x32xf32>
    %221 = vector.shape_cast %218 : vector<2x32xf32> to vector<2x1x32xf32>
    tpu.vector_store %arg12[%c0_49, %c6, %c0_50], %221 {strides = array<i32>} : memref<2x8x32xf32, #tpu.memory_space<vmem>>, vector<2x1x32xf32>,
    %222 = vector.extract_strided_slice %17 {offsets = [0, 7, 0], sizes = [2, 1, 96], strides = [1, 1, 1]} : vector<2x8x96xf32> to vector<2x1x96xf32>
    %223 = vector.shape_cast %222 : vector<2x1x96xf32> to vector<2x96xf32>
    %cst_51 = arith.constant dense<0.000000e+00> : vector<2x96xf32>
    %224 = tpu.matmul %218, %3, %cst_51 {dimension_numbers = #tpu.dot_dimension_numbers<[1], [0], [0], [1], [0, 0, 1, 1], [], []>} : vector<2x32xf32>, vector<32x96xf32>, vector<2x96xf32> -> vector<2x96xf32>
    %225 = vector.extract_strided_slice %223 {offsets = [0, 0], sizes = [2, 64], strides = [1, 1]} : vector<2x96xf32> to vector<2x64xf32>
    %226 = vector.extract_strided_slice %224 {offsets = [0, 0], sizes = [2, 64], strides = [1, 1]} : vector<2x96xf32> to vector<2x64xf32>
    %227 = arith.addf %225, %226 : vector<2x64xf32>
    %228 = arith.addf %227, %6 : vector<2x64xf32>
    %229 = arith.negf %228 : vector<2x64xf32>
    %230 = math.exp %229 : vector<2x64xf32>
    %cst_52 = arith.constant 1.000000e+00 : f32
    %231 = vector.broadcast %cst_52 : f32 to vector<2x64xf32>
    %232 = arith.addf %231, %230 : vector<2x64xf32>
    %233 = arith.divf %231, %232 : vector<2x64xf32>
    %234 = vector.extract_strided_slice %233 {offsets = [0, 0], sizes = [2, 32], strides = [1, 1]} : vector<2x64xf32> to vector<2x32xf32>
    %235 = vector.extract_strided_slice %233 {offsets = [0, 32], sizes = [2, 32], strides = [1, 1]} : vector<2x64xf32> to vector<2x32xf32>
    %236 = vector.extract_strided_slice %223 {offsets = [0, 64], sizes = [2, 32], strides = [1, 1]} : vector<2x96xf32> to vector<2x32xf32>
    %237 = arith.addf %236, %9 : vector<2x32xf32>
    %238 = vector.extract_strided_slice %224 {offsets = [0, 64], sizes = [2, 32], strides = [1, 1]} : vector<2x96xf32> to vector<2x32xf32>
    %239 = arith.addf %238, %12 : vector<2x32xf32>
    %240 = arith.mulf %234, %239 : vector<2x32xf32>
    %241 = arith.addf %237, %240 : vector<2x32xf32>
    %242 = math.tanh %241 : vector<2x32xf32>
    %cst_53 = arith.constant 1.000000e+00 : f32
    %243 = vector.broadcast %cst_53 : f32 to vector<2x32xf32>
    %244 = arith.subf %243, %235 : vector<2x32xf32>
    %245 = arith.mulf %244, %242 : vector<2x32xf32>
    %246 = arith.mulf %235, %218 : vector<2x32xf32>
    %247 = arith.addf %245, %246 : vector<2x32xf32>
    %c0_54 = arith.constant 0 : index
    %c7 = arith.constant 7 : index
    %c0_55 = arith.constant 0 : index
    %248 = vector.load %arg12[%c0_54, %c7, %c0_55] : memref<2x8x32xf32, #tpu.memory_space<vmem>>, vector<2x1x32xf32>
    %249 = vector.shape_cast %248 : vector<2x1x32xf32> to vector<2x32xf32>
    %250 = vector.shape_cast %247 : vector<2x32xf32> to vector<2x1x32xf32>
    tpu.vector_store %arg12[%c0_54, %c7, %c0_55], %250 {strides = array<i32>} : memref<2x8x32xf32, #tpu.memory_space<vmem>>, vector<2x1x32xf32>,
    %c0_56 = arith.constant 0 : index
    %c0_57 = arith.constant 0 : index
    %251 = vector.load %arg11[%c0_56, %c0_57] : memref<2x32xf32, #tpu.memory_space<vmem>>, vector<2x32xf32>
    tpu.vector_store %arg11[%c0_56, %c0_57], %247 {strides = array<i32>} : memref<2x32xf32, #tpu.memory_space<vmem>>, vector<2x32xf32>,
    %c3_i32 = arith.constant 3 : i32
    %252 = arith.cmpi eq, %arg0, %c3_i32 : i32
    %253 = arith.extui %252 : i1 to i32
    %c0_i32_58 = arith.constant 0 : i32
    %254 = arith.cmpi ne, %253, %c0_i32_58 : i32
    scf.if %254 {
      %c0_72 = arith.constant 0 : index
      %c0_73 = arith.constant 0 : index
      %269 = vector.load %arg10[%c0_72, %c0_73] : memref<2x32xf32, #tpu.memory_space<vmem>>, vector<2x32xf32>
      tpu.vector_store %arg10[%c0_72, %c0_73], %247 {strides = array<i32>} : memref<2x32xf32, #tpu.memory_space<vmem>>, vector<2x32xf32>,
    } else {
    }
    %c0_59 = arith.constant 0 : index
    %c0_60 = arith.constant 0 : index
    %c0_61 = arith.constant 0 : index
    %255 = vector.load %arg12[%c0_59, %c0_60, %c0_61] : memref<2x8x32xf32, #tpu.memory_space<vmem>>, vector<2x8x32xf32>
    %256 = vector.shape_cast %255 : vector<2x8x32xf32> to vector<16x32xf32>
    %c0_62 = arith.constant 0 : index
    %c0_63 = arith.constant 0 : index
    %257 = vector.load %arg7[%c0_62, %c0_63] : memref<32x26xf32, #tpu.memory_space<vmem>>, vector<32x26xf32>
    %cst_64 = arith.constant dense<0.000000e+00> : vector<16x26xf32>
    %258 = tpu.matmul %256, %257, %cst_64 {dimension_numbers = #tpu.dot_dimension_numbers<[1], [0], [0], [1], [0, 0, 1, 1], [], []>} : vector<16x32xf32>, vector<32x26xf32>, vector<16x26xf32> -> vector<16x26xf32>
    %c0_65 = arith.constant 0 : index
    %c0_66 = arith.constant 0 : index
    %259 = vector.load %arg8[%c0_65, %c0_66] : memref<1x26xf32, #tpu.memory_space<vmem>>, vector<1x26xf32>
    %260 = vector.broadcast %259 : vector<1x26xf32> to vector<16x26xf32>
    %261 = arith.addf %258, %260 : vector<16x26xf32>
    %cst_67 = arith.constant 0.000000e+00 : f32
    %262 = vector.broadcast %cst_67 : f32 to vector<16x26xf32>
    %263 = arith.cmpf oge, %261, %262 : vector<16x26xf32>
    %cst_68 = arith.constant 0.00999999977 : f32
    %264 = vector.broadcast %cst_68 : f32 to vector<16x26xf32>
    %265 = arith.mulf %264, %261 : vector<16x26xf32>
    %266 = arith.select %263, %261, %265 : vector<16x26xi1>, vector<16x26xf32>
    %267 = vector.shape_cast %266 : vector<16x26xf32> to vector<2x8x26xf32>
    %c0_69 = arith.constant 0 : index
    %c0_70 = arith.constant 0 : index
    %c0_71 = arith.constant 0 : index
    %268 = vector.load %arg9[%c0_69, %c0_70, %c0_71] : memref<2x8x26xf32, #tpu.memory_space<vmem>>, vector<2x8x26xf32>
    tpu.vector_store %arg9[%c0_69, %c0_70, %c0_71], %267 {strides = array<i32>} : memref<2x8x26xf32, #tpu.memory_space<vmem>>, vector<2x8x26xf32>,
    return
  }
  func.func @transform_0(%arg0: i32) -> (i32, i32, i32) {
    %c0_i32 = arith.constant 0 : i32
    %c0_i32_0 = arith.constant 0 : i32
    %c0_i32_1 = arith.constant 0 : i32
    return %c0_i32, %arg0, %c0_i32_0 : i32, i32, i32
  }
  func.func @transform_1(%arg0: i32) -> (i32, i32) {
    %c0_i32 = arith.constant 0 : i32
    %c0_i32_0 = arith.constant 0 : i32
    %c0_i32_1 = arith.constant 0 : i32
    return %c0_i32, %c0_i32_0 : i32, i32
  }
  func.func @transform_2(%arg0: i32) -> (i32, i32) {
    %c0_i32 = arith.constant 0 : i32
    %c0_i32_0 = arith.constant 0 : i32
    %c0_i32_1 = arith.constant 0 : i32
    return %c0_i32, %c0_i32_0 : i32, i32
  }
  func.func @transform_3(%arg0: i32) -> (i32, i32) {
    %c0_i32 = arith.constant 0 : i32
    %c0_i32_0 = arith.constant 0 : i32
    %c0_i32_1 = arith.constant 0 : i32
    return %c0_i32, %c0_i32_0 : i32, i32
  }
  func.func @transform_4(%arg0: i32) -> (i32, i32) {
    %c0_i32 = arith.constant 0 : i32
    %c0_i32_0 = arith.constant 0 : i32
    %c0_i32_1 = arith.constant 0 : i32
    return %c0_i32, %c0_i32_0 : i32, i32
  }
  func.func @transform_5(%arg0: i32) -> (i32, i32) {
    %c0_i32 = arith.constant 0 : i32
    %c0_i32_0 = arith.constant 0 : i32
    %c0_i32_1 = arith.constant 0 : i32
    return %c0_i32, %c0_i32_0 : i32, i32
  }
  func.func @transform_6(%arg0: i32) -> (i32, i32) {
    %c0_i32 = arith.constant 0 : i32
    %c0_i32_0 = arith.constant 0 : i32
    %c0_i32_1 = arith.constant 0 : i32
    return %c0_i32, %c0_i32_0 : i32, i32
  }
  func.func @transform_7(%arg0: i32) -> (i32, i32) {
    %c0_i32 = arith.constant 0 : i32
    %c0_i32_0 = arith.constant 0 : i32
    %c0_i32_1 = arith.constant 0 : i32
    return %c0_i32, %c0_i32_0 : i32, i32
  }
  func.func @transform_8(%arg0: i32) -> (i32, i32, i32) {
    %c0_i32 = arith.constant 0 : i32
    %c0_i32_0 = arith.constant 0 : i32
    %c0_i32_1 = arith.constant 0 : i32
    return %c0_i32, %arg0, %c0_i32_0 : i32, i32, i32
  }
  func.func @transform_9(%arg0: i32) -> (i32, i32) {
    %c0_i32 = arith.constant 0 : i32
    %c0_i32_0 = arith.constant 0 : i32
    %c0_i32_1 = arith.constant 0 : i32
    return %c0_i32, %c0_i32_0 : i32, i32
  }
}

</mosaic_0001>

<bundles_post_ra>
// kernel: tpu_custom_call.1
= control target key start
LH: loop header
LB: loop body
LE: loop exit
PB: predicated region body
PF: predicated region fallthrough
CT: control target
= control target key end

     0   :  { %15 = vsyncpa [#allocation7], 0  ;;  %s2407_s30 = smov 0   ;;  %s2409_s10 = smov 0   ;;  %s2865_s0 = inlined_call_operand.vmem [shape: f32[2,32,26], index: 0, kind: input, shape index: {}]   ;;  %s2866_s1 = inlined_call_operand.vmem [shape: f32[26,96], index: 1, kind: input, shape index: {}]   ;;  %s2867_s2 = inlined_call_operand.vmem [shape: f32[32,96], index: 2, kind: input, shape index: {}]   ;;  %s2868_s3 = inlined_call_operand.vmem [shape: f32[1,64], index: 3, kind: input, shape index: {}]   ;;  %s2869_s4 = inlined_call_operand.vmem [shape: f32[1,32], index: 4, kind: input, shape index: {}]   ;;  %s2870_s5 = inlined_call_operand.vmem [shape: f32[1,32], index: 5, kind: input, shape index: {}]   ;;  %s2871_s6 = inlined_call_operand.vmem [shape: f32[32,26], index: 6, kind: input, shape index: {}]   ;;  %s2872_s7 = inlined_call_operand.vmem [shape: f32[1,26], index: 7, kind: input, shape index: {}]   ;;  %s2873_s8 = inlined_call_operand.vmem [shape: f32[2,32,26], index: 8, kind: output, shape index: {0}]   ;;  %s2874_s9 = inlined_call_operand.hbm [shape: f32[2,32], index: 9, kind: output, shape index: {1}]  }
   0x1   :  { %s2411_s11 = smov 0  }
   0x2 LB: > { %s2420_s12 = sadd.s32 4294967295, %s2348_s11   ;;  %s2422_s13 = sadd.s32 1, %s2348_s11   ;;  %s2348_s11 = sphi %s2411_s11, %s2878_s11   ;;  %s2344_s10 = sphi %s2409_s10, %s2877_s10   ;;  %s2340_s30 = sphi %s2407_s30, %s2876_s30  }
   0x3   : > { %s25_s14 = ssub.s32 %s2348_s11, %s2422_s13  ;;  %s28_s15 = sadd.s32 1, %s2344_s10 }
   0x4   : > { %p26_p0 = scmp.eq.s32.totalorder %s25_s14, 0  ;;  %p35_p1 = scmp.ne.s32.totalorder %s2344_s10, %s2340_s30 }
   0x5   : > { %p36_p2 = scmp.eq.s32.totalorder %s2348_s11, 0  ;;  %p212_p3 = scmp.eq.s32.totalorder %s2420_s12, 3 }
   0x6   : > { %s2430_s16 = scalar_select %p26_p0, %s2344_s10, %s28_s15  }
   0x7   : > { %p37_p4 = por %p36_p2, %p35_p1  ;;  %p2434_p5 = por %p212_p3, %p35_p1 }
   0x8   : > { %p1956_p6 = scmp.ge.s32.totalorder %s2348_s11, 4 }
   0xa   : > { %276 = sbr.rel (%p1956_p6) target bundleno = 21 (0x15), region = 44 }
   0xf   : > { %279 = sbr.rel (!%p37_p4) target bundleno = 21 (0x15), region = 48  ;;  %s281_s18 = sand.u32 (%p37_p4), 1, %s2344_s10  }
  0x10   : > { %s1958_s19 = sshll.u32 (%p37_p4), %s2348_s11, 3  ;;  %s1957_s20 = sshll.u32 (%p37_p4), %s281_s18, 4 }
  0x11   : > { %s285_s23 = scalar_lea.vmem (%p37_p4), %s2865_s0, %s1958_s19  ;;  %s283_s24 = scalar_lea.vmem (%p37_p4), [#allocation4], %s1957_s20 }
  0x12   : > { %v316_v0 = vld [vmem:[%s285_s23] sm:$0xff] (%p37_p4) }
  0x13   : > { %v318_v1 = vld [vmem:[%s285_s23 + $0x20] sm:$0xff] (%p37_p4)  ;;  %317 = vst [vmem:[%s283_s24] sm:$0xff] (%p37_p4), %v316_v0 }
  0x14   : > { %319 = vst [vmem:[%s283_s24 + $0x8] sm:$0xff] %v318_v1 }
  0x15 PF: > { %p1959_p7 = scmp.ge.s32.totalorder %s2348_s11, 1  ;;  %p324_p8 = scmp.lt.s32.totalorder %s2348_s11, 5 }
  0x17   : > { %p325_p9 = pnand %p1959_p7, %p324_p8 }
  0x18   : > { %s331_s25 = sand.u32 (!%p325_p9), 1, %s2340_s30   ;;  %p1962_p10 = scmp.ne.s32.totalorder (!%p325_p9), %s2420_s12, 0 }
  0x19   : > { %328 = sbr.rel (%p325_p9) target bundleno = 5748 (0x1674), region = 86  ;;  %s2443_s26 = sshll.u32 (!%p325_p9), %s331_s25, 4 }
  0x1a   : > { %s333_s27 = scalar_lea.vmem (!%p325_p9), [#allocation4], %s2443_s26  ;;  %s2447_s28 = scalar_lea.vmem (!%p325_p9), [#allocation5], %s2443_s26 }
  0x1e   : > { %368 = sbr.rel (%p1962_p10) target bundleno = 37 (0x25), region = 94 }
  0x23   : > { %vm369_vm0 = vcmask 254976   ;;  %v2350_v2 = vmov 0.0  }
  0x24   : > { %370 = vst.msk [vmem:[#allocation2] sm:$0x3] %vm369_vm0, %v2350_v2 }
  0x25 PF: > { %v399_v3 = vld [vmem:[%s2866_s1 + $0x18] sm:$0x3]  ;;  %vm407_vm1 = vcmask 1041408   ;;  %v398_v5 = vld [vmem:[%s2866_s1 + $0x10] sm:$0xff]  ;;  %v2351_v6 = vmov 0.0   ;;  %v397_v8 = vld [vmem:[%s2866_s1 + $0x8] sm:$0xff] }
  0x26   : > { %v2456_v4 = vld [vmem:[%s2867_s2 + $0x18] sm:$0xff]  ;;  %2055 = vmatprep.subr.msk.mxu0 %vm407_vm1, %v399_v3  ;;  %2066 = vmatprep.subr.mxu1 %v2351_v6  ;;  %v2465_v7 = vld [vmem:[%s2867_s2 + $0x10] sm:$0xff]  ;;  %v2475_v9 = vld [vmem:[%s2867_s2 + $0x8] sm:$0xff]  ;;  %vm400_vm2 = vcmask 211968   ;;  %vm487_vm3 = vcmask 261120   ;;  %vm2352_vm4 = vmmov 0  }
  0x27   : > { %2056 = vmatpush3.msk.msra.mxu0 %vm407_vm1, %v399_v3  ;;  %2067 = vmatpush3.msra.mxu1 %v2456_v4  ;;  %v396_v10 = vld [vmem:[%s2866_s1] sm:$0xff]  ;;  %s2353_s26 = smov 64   ;;  %s2354_s21 = smov 32   ;;  %vm647_vm5 = vcmask 1041409   ;;  %vm643_vm6 = vcmask 253952   ;;  %vm793_vm7 = vcmask 254977  }
  0x28   : > { %2057 = vmatprep.subr.mxu0 %v398_v5  ;;  %2068 = vmatprep.subr.mxu1 %v2351_v6  ;;  %v394_v11 = vld [vmem:[%s333_s27] sm:$0xff]  ;;  %v395_v13 = vld [vmem:[%s333_s27 + $0x8] sm:$0xff]  ;;  %s2355_s22 = smov 96   ;;  %vm945_vm8 = vcmask 256002   ;;  %vm1098_vm9 = vcmask 257027   ;;  %vm1251_vm10 = vcmask 258052  }
  0x29   : > { %2058 = vmatpush3.msra.mxu0 %v398_v5  ;;  %2069 = vmatpush3.msra.mxu1 %v2465_v7  ;;  %v2488_v12 = vld [vmem:[%s2867_s2] sm:$0xff]  ;;  %vm1404_vm11 = vcmask 259077   ;;  %vm1557_vm12 = vcmask 260102   ;;  %vm1710_vm13 = vcmask 261127   ;;  %p1993_p11 = scmp.ne.s32.totalorder %s2420_s12, 3 }
  0x2a   : > { %2059 = vmatprep.subr.mxu0 %v397_v8  ;;  %2070 = vmatprep.subr.mxu1 %v2351_v6  ;;  %v1965_v15 = vld [vmem:[%s2870_s5] ss:$0 sm:$0xff] }
  0x2b   : > { %2060 = vmatpush3.msra.mxu0 %v397_v8  ;;  %2071 = vmatpush3.msra.mxu1 %v2475_v9  ;;  %v2493_v14 = vld [vmem:[#allocation2] sm:$0x3] }
  0x2c   : > { %2061 = vmatprep.subr.mxu0 %v396_v10  ;;  %2072 = vmatprep.subr.mxu1 %v2351_v6  ;;  %v1964_v21 = vld [vmem:[%s2869_s4] ss:$0 sm:$0xff]  ;;  %v624_v42 = vrot.slane %v2493_v14, 1 }
  0x2d   : > { %2062 = vmatpush3.msra.mxu0 %v396_v10  ;;  %2063 = vmatprep.mubr.msk.f32.mxu0 %vm400_vm2, %v394_v11  ;;  %v2545_v26 = vld [vmem:[%s2868_s3] ss:$0 sm:$0xff] }
  0x2e   : > { %2073 = vmatpush3.msra.mxu1 %v2488_v12  ;;  %2074 = vmatprep.mubr.msk.f32.mxu1 %vm2352_vm4, %v2351_v6 }
  0x2f   : > { %2064 = vmatmul.mubr.msk.f32.vlgmr.msra.gmra.mxu0 %vm400_vm2, %v395_v13  ;;  %2075 = vmatmul.mubr.msk.f32.vlgmr.msra.gmra.mxu1 %vm487_vm3, %v2493_v14 }
  0x30   : > { %586 = vrot.lane.b32.xlu0 %v1965_v15, %s2353_s26  ;;  %2077 = vmatprep.subr.mxu0 %v2351_v6 }
  0x31   : > { %2078 = vmatpush3.msra.mxu0 %v2456_v4  ;;  %2085 = vmatprep.mubr.msk.f32.mxu0 %vm2352_vm4, %v2351_v6 }
  0x32   : > { %2079 = vmatprep.subr.mxu0 %v2351_v6  ;;  %2088 = vmatprep.subr.mxu1 %v2351_v6 }
  0x33   : > { %2080 = vmatpush3.msra.mxu0 %v2465_v7  ;;  %2089 = vmatpush3.msra.mxu1 %v2456_v4 }
  0x34   : > { %2081 = vmatprep.subr.mxu0 %v2351_v6  ;;  %2090 = vmatprep.subr.mxu1 %v2351_v6 }
  0x35   : > { %2082 = vmatpush3.msra.mxu0 %v2475_v9  ;;  %2091 = vmatpush3.msra.mxu1 %v2465_v7 }
  0x36   : > { %2083 = vmatprep.subr.mxu0 %v2351_v6  ;;  %2092 = vmatprep.subr.mxu1 %v2351_v6 }
  0x37   : > { %2084 = vmatpush3.msra.mxu0 %v2488_v12  ;;  %2093 = vmatpush3.msra.mxu1 %v2475_v9 }
  0x38   : > { %2094 = vmatprep.subr.mxu1 %v2351_v6  ;;  %2096 = vmatprep.mubr.msk.f32.mxu1 %vm2352_vm4, %v2351_v6 }
  0x39   : > { %2095 = vmatpush3.msra.mxu1 %v2488_v12  ;;  %2099 = vmatprep.subr.mxu0 %v2351_v6 }
  0x3a   : > { %2110 = vmatprep.subr.mxu1 %v2351_v6 }
  0xa2   : > { %v2528_v16 = vpop.permute.xlu0 %586 }
  0xef   : > { %v557_v17 = vpop.f32.mrf.mxu1  ;;  %v2537_v22 = vpop.f32.mrf.mxu0 }
  0xf0   : > { %v589_v18 = vadd.f32 %v2528_v16, %v557_v17  ;;  %v562_v24 = vrot.slane %v557_v17, 1 }
  0xf1   : > { %v2076_v19 = vpop.f32.mrf.mxu1  ;;  %v2539_v23 = vpop.f32.mrf.mxu0 }
  0xf2   : > { %592 = vrot.lane.b32.xlu1 %v589_v18, %s2353_s26  ;;  %v591_v20 = vrot.slane %v589_v18, 1  ;;  %v565_v25 = vadd.f32 %v557_v17, %v2539_v23  ;;  %v566_v27 = vadd.f32 %v2537_v22, %v562_v24 }
  0xf4   : > { %594 = vrot.lane.b32.xlu0 %v591_v20, %s2353_s26  ;;  %v567_v28 = vadd.f32 %v2545_v26, %v565_v25  ;;  %v568_v29 = vadd.f32 %v2545_v26, %v566_v27 }
  0xf6   : > { %581 = vrot.lane.b32.xlu1 %v1964_v21, %s2353_s26  ;;  %v1970_v30 = vmul.f32 -1.442695, %v567_v28  ;;  %v1971_v31 = vmul.f32 -1.442695, %v568_v29 }
  0xf8   : > { %2202 = vpow2.f32 %v1970_v30 }
  0xf9   : > { %2204 = vpow2.f32 %v1971_v31 }
 0x105   : > { %v2203_v32 = vpop.eup %2202 }
 0x106   : > { %v2205_v33 = vpop.eup %2204  ;;  %v575_v34 = vadd.f32 1.0, %v2203_v32 }
 0x107   : > { %v576_v35 = vadd.f32 1.0, %v2205_v33 }
 0x108   : > { %2206 = vrcp.f32 %v575_v34 }
 0x109   : > { %2208 = vrcp.f32 %v576_v35 }
 0x115   : > { %v2207_v36 = vpop.eup %2206 }
 0x116   : > { %v2209_v39 = vpop.eup %2208  ;;  %v612_v59 = vsub.f32 1.0, %v2207_v36 }
 0x117   : > { %v613_v53 = vsub.f32 1.0, %v2209_v39 }
 0x164   : > { %v593_v37 = vpop.permute.xlu1 %592 }
 0x165   : > { %v598_v38 = vmul.f32 %v2207_v36, %v593_v37 }
 0x166   : > { %v595_v40 = vpop.permute.xlu0 %594 }
 0x167   : > { %v599_v41 = vmul.f32 %v2209_v39, %v595_v40  ;;  %602 = vrot.lane.b32.xlu1 %v598_v38, %s2353_s26 }
 0x168   : > { %v582_v43 = vpop.permute.xlu1 %581 }
 0x169   : > { %604 = vrot.lane.b32.xlu0 %v599_v41, %s2353_s26  ;;  %v2555_v44 = vadd.f32 %v2537_v22, %v582_v43  ;;  %v2558_v47 = vadd.f32 %v582_v43, %v2539_v23 }
 0x16b   : > { %627 = vrot.lane.b32.xlu1 %v624_v42, %s2354_s21 }
 0x16f   : > { %625 = vrot.lane.b32.xlu1 %v2493_v14, %s2354_s21 }
 0x1d9   : > { %v603_v45 = vpop.permute.xlu1 %602 }
 0x1da   : > { %v608_v49 = vadd.f32 %v603_v45, %v2558_v47 }
 0x1db   : > { %v605_v46 = vpop.permute.xlu0 %604 }
 0x1dc   : > { %v609_v48 = vadd.f32 %v605_v46, %v2555_v44 }
 0x1dd   : > { %v628_v52 = vpop.permute.xlu1 %627 }
 0x1de   : > { %2210 = vtanh.f32 %v609_v48  ;;  %v632_v55 = vmul.f32 %v2209_v39, %v628_v52 }
 0x1df   : > { %2212 = vtanh.f32 %v608_v49 }
 0x1e1   : > { %v626_v57 = vpop.permute.xlu1 %625 }
 0x1e2   : > { %v631_v61 = vmul.f32 %v2207_v36, %v626_v57 }
 0x1eb   : > { %v2211_v50 = vpop.eup %2210 }
 0x1ec   : > { %618 = vrot.lane.b32.xlu0 %v2211_v50, %s2355_s22  ;;  %v2213_v51 = vpop.eup %2212 }
 0x1f0   : > { %616 = vrot.lane.b32.xlu0 %v2213_v51, %s2355_s22 }
 0x25e   : > { %v619_v54 = vpop.permute.xlu0 %618 }
 0x25f   : > { %v623_v56 = vmul.f32 %v619_v54, %v613_v53 }
 0x261   : > { %v2564_v58 = vadd.f32 %v632_v55, %v623_v56 }
 0x262   : > { %v617_v60 = vpop.permute.xlu0 %616 }
 0x263   : > { %v622_v62 = vmul.f32 %v617_v60, %v612_v59  ;;  %v646_v63 = vrot.slane %v2564_v58, 7 }
 0x265   : > { %v2567_v0 = vadd.f32 %v631_v61, %v622_v62 }
 0x267   : > { %v648_v1 = vsel %vm647_vm5, %v646_v63, %v2567_v0  ;;  %v778_v42 = vrot.slane %v2567_v0, 7 }
 0x268   : > { %649 = vrot.lane.b32.xlu0 %v648_v1, %s2355_s22 }
 0x2da   : > { %v650_v2 = vpop.permute.xlu0 %649 }
 0x2db   : > { %2086 = vmatmul.mubr.msk.f32.vlgmr.msra.gmra.mxu0 %vm487_vm3, %v650_v2 }
 0x2dc   : > { %2100 = vmatpush3.msra.mxu0 %v2456_v4  ;;  %2107 = vmatprep.mubr.msk.f32.mxu0 %vm2352_vm4, %v2351_v6 }
 0x2dd   : > { %2101 = vmatprep.subr.mxu0 %v2351_v6 }
 0x2de   : > { %2102 = vmatpush3.msra.mxu0 %v2465_v7 }
 0x2df   : > { %2103 = vmatprep.subr.mxu0 %v2351_v6 }
 0x2e0   : > { %2104 = vmatpush3.msra.mxu0 %v2475_v9 }
 0x2e1   : > { %2105 = vmatprep.subr.mxu0 %v2351_v6 }
 0x2e2   : > { %2106 = vmatpush3.msra.mxu0 %v2488_v12 }
 0x2e3   : > { %2121 = vmatprep.subr.mxu0 %v2351_v6 }
 0x39b   : > { %v719_v3 = vpop.f32.mrf.mxu0 }
 0x39c   : > { %v743_v5 = vadd.f32 %v719_v3, %v2528_v16  ;;  %v724_v11 = vrot.slane %v719_v3, 7  ;;  %v728_v13 = vadd.f32 %v2537_v22, %v719_v3 }
 0x39d   : > { %v2087_v8 = vpop.f32.mrf.mxu0 }
 0x39e   : > { %748 = vrot.lane.b32.xlu0 %v743_v5, %s2353_s26  ;;  %v745_v10 = vrot.slane %v743_v5, 7  ;;  %v727_v14 = vadd.f32 %v724_v11, %v2539_v23  ;;  %v730_v15 = vadd.f32 %v2545_v26, %v728_v13 }
 0x3a0   : > { %746 = vrot.lane.b32.xlu1 %v745_v10, %s2353_s26  ;;  %v729_v17 = vadd.f32 %v2545_v26, %v727_v14  ;;  %v1974_v18 = vmul.f32 -1.442695, %v730_v15 }
 0x3a2   : > { %v1973_v19 = vmul.f32 -1.442695, %v729_v17  ;;  %2214 = vpow2.f32 %v1974_v18 }
 0x3a4   : > { %2216 = vpow2.f32 %v1973_v19 }
 0x3af   : > { %v2215_v20 = vpop.eup %2214 }
 0x3b0   : > { %v738_v24 = vadd.f32 1.0, %v2215_v20 }
 0x3b1   : > { %v2217_v21 = vpop.eup %2216 }
 0x3b2   : > { %v737_v25 = vadd.f32 1.0, %v2217_v21  ;;  %2218 = vrcp.f32 %v738_v24 }
 0x3b4   : > { %2220 = vrcp.f32 %v737_v25 }
 0x3bf   : > { %v2219_v27 = vpop.eup %2218 }
 0x3c0   : > { %v767_v40 = vsub.f32 1.0, %v2219_v27  ;;  %v782_v49 = vmul.f32 %v2219_v27, %v646_v63 }
 0x3c1   : > { %v2221_v30 = vpop.eup %2220 }
 0x3c2   : > { %v766_v41 = vsub.f32 1.0, %v2221_v30  ;;  %v781_v46 = vmul.f32 %v2221_v30, %v778_v42 }
 0x410   : > { %v749_v28 = vpop.permute.xlu0 %748 }
 0x411   : > { %v753_v29 = vmul.f32 %v2219_v27, %v749_v28 }
 0x412   : > { %v747_v31 = vpop.permute.xlu1 %746 }
 0x413   : > { %v752_v32 = vmul.f32 %v2221_v30, %v747_v31  ;;  %758 = vrot.lane.b32.xlu0 %v753_v29, %s2353_s26 }
 0x415   : > { %756 = vrot.lane.b32.xlu1 %v752_v32, %s2353_s26 }
 0x485   : > { %v759_v33 = vpop.permute.xlu0 %758 }
 0x486   : > { %v763_v34 = vadd.f32 %v759_v33, %v2555_v44 }
 0x487   : > { %v757_v35 = vpop.permute.xlu1 %756 }
 0x488   : > { %2222 = vtanh.f32 %v763_v34  ;;  %v762_v36 = vadd.f32 %v757_v35, %v2558_v47 }
 0x48a   : > { %2224 = vtanh.f32 %v762_v36 }
 0x495   : > { %v2223_v37 = vpop.eup %2222 }
 0x496   : > { %772 = vrot.lane.b32.xlu0 %v2223_v37, %s2355_s22 }
 0x497   : > { %v2225_v38 = vpop.eup %2224 }
 0x498   : > { %770 = vrot.lane.b32.xlu1 %v2225_v38, %s2355_s22 }
 0x508   : > { %v773_v39 = vpop.permute.xlu0 %772 }
 0x509   : > { %v777_v45 = vmul.f32 %v773_v39, %v767_v40 }
 0x50a   : > { %v771_v43 = vpop.permute.xlu1 %770 }
 0x50b   : > { %v776_v48 = vmul.f32 %v771_v43, %v766_v41  ;;  %v2599_v51 = vadd.f32 %v782_v49, %v777_v45 }
 0x50d   : > { %v2597_v50 = vadd.f32 %v781_v46, %v776_v48  ;;  %v930_v32 = vrot.slane %v2599_v51, 7 }
 0x50f   : > { %v796_v52 = vrot.slane %v2597_v50, 1  ;;  %v929_v35 = vrot.slane %v2597_v50, 7 }
 0x511   : > { %v797_v53 = vsel %vm647_vm5, %v2599_v51, %v796_v52 }
 0x512   : > { %798 = vrot.lane.b32.xlu1 %v797_v53, %s2355_s22 }
 0x584   : > { %v799_v54 = vpop.permute.xlu1 %798 }
 0x585   : > { %2097 = vmatmul.mubr.msk.f32.vlgmr.msra.gmra.mxu1 %vm487_vm3, %v799_v54 }
 0x586   : > { %2111 = vmatpush3.msra.mxu1 %v2456_v4  ;;  %2118 = vmatprep.mubr.msk.f32.mxu1 %vm2352_vm4, %v2351_v6 }
 0x587   : > { %2112 = vmatprep.subr.mxu1 %v2351_v6 }
 0x588   : > { %2113 = vmatpush3.msra.mxu1 %v2465_v7 }
 0x589   : > { %2114 = vmatprep.subr.mxu1 %v2351_v6 }
 0x58a   : > { %2115 = vmatpush3.msra.mxu1 %v2475_v9 }
 0x58b   : > { %2116 = vmatprep.subr.mxu1 %v2351_v6 }
 0x58c   : > { %2117 = vmatpush3.msra.mxu1 %v2488_v12 }
 0x58d   : > { %2132 = vmatprep.subr.mxu1 %v2351_v6 }
 0x645   : > { %v868_v55 = vpop.f32.mrf.mxu1 }
 0x646   : > { %v893_v56 = vadd.f32 %v868_v55, %v2528_v16  ;;  %v873_v61 = vrot.slane %v868_v55, 6  ;;  %v874_v62 = vrot.slane %v868_v55, 7 }
 0x647   : > { %v2098_v57 = vpop.f32.mrf.mxu1 }
 0x648   : > { %v896_v59 = vrot.slane %v893_v56, 7  ;;  %v895_v60 = vrot.slane %v893_v56, 6  ;;  %v877_v63 = vadd.f32 %v873_v61, %v2539_v23  ;;  %v878_v1 = vadd.f32 %v2537_v22, %v874_v62 }
 0x64a   : > { %899 = vrot.lane.b32.xlu1 %v896_v59, %s2353_s26  ;;  %897 = vrot.lane.b32.xlu0 %v895_v60, %s2353_s26  ;;  %v879_v2 = vadd.f32 %v2545_v26, %v877_v63  ;;  %v880_v3 = vadd.f32 %v2545_v26, %v878_v1 }
 0x64c   : > { %v1976_v5 = vmul.f32 -1.442695, %v879_v2  ;;  %v1977_v8 = vmul.f32 -1.442695, %v880_v3 }
 0x64e   : > { %2226 = vpow2.f32 %v1976_v5 }
 0x64f   : > { %2228 = vpow2.f32 %v1977_v8 }
 0x65b   : > { %v2227_v10 = vpop.eup %2226 }
 0x65c   : > { %v2229_v11 = vpop.eup %2228  ;;  %v887_v13 = vadd.f32 1.0, %v2227_v10 }
 0x65d   : > { %v888_v14 = vadd.f32 1.0, %v2229_v11 }
 0x65e   : > { %2230 = vrcp.f32 %v887_v13 }
 0x65f   : > { %2232 = vrcp.f32 %v888_v14 }
 0x66b   : > { %v2231_v15 = vpop.eup %2230 }
 0x66c   : > { %v2233_v17 = vpop.eup %2232  ;;  %v917_v34 = vsub.f32 1.0, %v2231_v15  ;;  %v933_v39 = vmul.f32 %v2231_v15, %v929_v35 }
 0x66d   : > { %v918_v31 = vsub.f32 1.0, %v2233_v17  ;;  %v934_v36 = vmul.f32 %v2233_v17, %v930_v32 }
 0x6bc   : > { %v900_v18 = vpop.permute.xlu1 %899  ;;  %v898_v19 = vpop.permute.xlu0 %897 }
 0x6bd   : > { %v904_v20 = vmul.f32 %v2233_v17, %v900_v18  ;;  %v903_v21 = vmul.f32 %v2231_v15, %v898_v19 }
 0x6bf   : > { %909 = vrot.lane.b32.xlu1 %v904_v20, %s2353_s26  ;;  %907 = vrot.lane.b32.xlu0 %v903_v21, %s2353_s26 }
 0x731   : > { %v910_v24 = vpop.permute.xlu1 %909  ;;  %v908_v25 = vpop.permute.xlu0 %907 }
 0x732   : > { %v914_v27 = vadd.f32 %v910_v24, %v2555_v44  ;;  %v913_v28 = vadd.f32 %v908_v25, %v2558_v47 }
 0x734   : > { %2234 = vtanh.f32 %v914_v27 }
 0x735   : > { %2236 = vtanh.f32 %v913_v28 }
 0x741   : > { %v2235_v29 = vpop.eup %2234 }
 0x742   : > { %v2237_v30 = vpop.eup %2236  ;;  %923 = vrot.lane.b32.xlu1 %v2235_v29, %s2355_s22 }
 0x743   : > { %921 = vrot.lane.b32.xlu0 %v2237_v30, %s2355_s22 }
 0x7b4   : > { %v924_v33 = vpop.permute.xlu1 %923 }
 0x7b5   : > { %v928_v37 = vmul.f32 %v924_v33, %v918_v31  ;;  %v922_v38 = vpop.permute.xlu0 %921 }
 0x7b6   : > { %v927_v40 = vmul.f32 %v922_v38, %v917_v34 }
 0x7b7   : > { %v2631_v41 = vadd.f32 %v934_v36, %v928_v37 }
 0x7b8   : > { %v2633_v42 = vadd.f32 %v933_v39, %v927_v40 }
 0x7b9   : > { %v949_v43 = vrot.slane %v2631_v41, 1  ;;  %v1083_v28 = vrot.slane %v2631_v41, 7 }
 0x7ba   : > { %v948_v45 = vrot.slane %v2633_v42, 2  ;;  %v1082_v31 = vrot.slane %v2633_v42, 7 }
 0x7bc   : > { %v950_v46 = vsel %vm647_vm5, %v949_v43, %v948_v45 }
 0x7bd   : > { %951 = vrot.lane.b32.xlu0 %v950_v46, %s2355_s22 }
 0x82f   : > { %v952_v48 = vpop.permute.xlu0 %951 }
 0x830   : > { %2108 = vmatmul.mubr.msk.f32.vlgmr.msra.gmra.mxu0 %vm487_vm3, %v952_v48 }
 0x831   : > { %2122 = vmatpush3.msra.mxu0 %v2456_v4  ;;  %2129 = vmatprep.mubr.msk.f32.mxu0 %vm2352_vm4, %v2351_v6 }
 0x832   : > { %2123 = vmatprep.subr.mxu0 %v2351_v6 }
 0x833   : > { %2124 = vmatpush3.msra.mxu0 %v2465_v7 }
 0x834   : > { %2125 = vmatprep.subr.mxu0 %v2351_v6 }
 0x835   : > { %2126 = vmatpush3.msra.mxu0 %v2475_v9 }
 0x836   : > { %2127 = vmatprep.subr.mxu0 %v2351_v6 }
 0x837   : > { %2128 = vmatpush3.msra.mxu0 %v2488_v12 }
 0x838   : > { %2143 = vmatprep.subr.mxu0 %v2351_v6 }
 0x8f0   : > { %v1021_v49 = vpop.f32.mrf.mxu0 }
 0x8f1   : > { %v1046_v52 = vadd.f32 %v1021_v49, %v2528_v16  ;;  %v1026_v56 = vrot.slane %v1021_v49, 5  ;;  %v1027_v57 = vrot.slane %v1021_v49, 6 }
 0x8f2   : > { %v2109_v53 = vpop.f32.mrf.mxu0 }
 0x8f3   : > { %v1049_v54 = vrot.slane %v1046_v52, 6  ;;  %v1048_v55 = vrot.slane %v1046_v52, 5  ;;  %v1030_v59 = vadd.f32 %v1026_v56, %v2539_v23  ;;  %v1031_v60 = vadd.f32 %v2537_v22, %v1027_v57 }
 0x8f5   : > { %1052 = vrot.lane.b32.xlu0 %v1049_v54, %s2353_s26  ;;  %1050 = vrot.lane.b32.xlu1 %v1048_v55, %s2353_s26  ;;  %v1032_v61 = vadd.f32 %v2545_v26, %v1030_v59  ;;  %v1033_v62 = vadd.f32 %v2545_v26, %v1031_v60 }
 0x8f7   : > { %v1979_v63 = vmul.f32 -1.442695, %v1032_v61  ;;  %v1980_v1 = vmul.f32 -1.442695, %v1033_v62 }
 0x8f9   : > { %2238 = vpow2.f32 %v1979_v63 }
 0x8fa   : > { %2240 = vpow2.f32 %v1980_v1 }
 0x906   : > { %v2239_v2 = vpop.eup %2238 }
 0x907   : > { %v2241_v3 = vpop.eup %2240  ;;  %v1040_v5 = vadd.f32 1.0, %v2239_v2 }
 0x908   : > { %v1041_v8 = vadd.f32 1.0, %v2241_v3 }
 0x909   : > { %2242 = vrcp.f32 %v1040_v5 }
 0x90a   : > { %2244 = vrcp.f32 %v1041_v8 }
 0x916   : > { %v2243_v10 = vpop.eup %2242 }
 0x917   : > { %v2245_v11 = vpop.eup %2244  ;;  %v1070_v30 = vsub.f32 1.0, %v2243_v10  ;;  %v1086_v35 = vmul.f32 %v2243_v10, %v1082_v31 }
 0x918   : > { %v1071_v27 = vsub.f32 1.0, %v2245_v11  ;;  %v1087_v32 = vmul.f32 %v2245_v11, %v1083_v28 }
 0x967   : > { %v1053_v13 = vpop.permute.xlu0 %1052  ;;  %v1051_v14 = vpop.permute.xlu1 %1050 }
 0x968   : > { %v1057_v15 = vmul.f32 %v2245_v11, %v1053_v13  ;;  %v1056_v17 = vmul.f32 %v2243_v10, %v1051_v14 }
 0x96a   : > { %1062 = vrot.lane.b32.xlu0 %v1057_v15, %s2353_s26  ;;  %1060 = vrot.lane.b32.xlu1 %v1056_v17, %s2353_s26 }
 0x9dc   : > { %v1063_v18 = vpop.permute.xlu0 %1062  ;;  %v1061_v19 = vpop.permute.xlu1 %1060 }
 0x9dd   : > { %v1067_v20 = vadd.f32 %v1063_v18, %v2555_v44  ;;  %v1066_v21 = vadd.f32 %v1061_v19, %v2558_v47 }
 0x9df   : > { %2246 = vtanh.f32 %v1067_v20 }
 0x9e0   : > { %2248 = vtanh.f32 %v1066_v21 }
 0x9ec   : > { %v2247_v24 = vpop.eup %2246 }
 0x9ed   : > { %v2249_v25 = vpop.eup %2248  ;;  %1076 = vrot.lane.b32.xlu0 %v2247_v24, %s2355_s22 }
 0x9ee   : > { %1074 = vrot.lane.b32.xlu1 %v2249_v25, %s2355_s22 }
 0xa5f   : > { %v1077_v29 = vpop.permute.xlu0 %1076 }
 0xa60   : > { %v1081_v33 = vmul.f32 %v1077_v29, %v1071_v27  ;;  %v1075_v34 = vpop.permute.xlu1 %1074 }
 0xa61   : > { %v1080_v36 = vmul.f32 %v1075_v34, %v1070_v30 }
 0xa62   : > { %v2665_v37 = vadd.f32 %v1087_v32, %v1081_v33 }
 0xa63   : > { %v2667_v38 = vadd.f32 %v1086_v35, %v1080_v36 }
 0xa64   : > { %v1102_v39 = vrot.slane %v2665_v37, 2  ;;  %v1236_v25 = vrot.slane %v2665_v37, 7 }
 0xa65   : > { %v1101_v40 = vrot.slane %v2667_v38, 3  ;;  %v1235_v29 = vrot.slane %v2667_v38, 7 }
 0xa67   : > { %v1103_v43 = vsel %vm647_vm5, %v1102_v39, %v1101_v40 }
 0xa68   : > { %1104 = vrot.lane.b32.xlu1 %v1103_v43, %s2355_s22 }
 0xada   : > { %v1105_v45 = vpop.permute.xlu1 %1104 }
 0xadb   : > { %2119 = vmatmul.mubr.msk.f32.vlgmr.msra.gmra.mxu1 %vm487_vm3, %v1105_v45 }
 0xadc   : > { %2133 = vmatpush3.msra.mxu1 %v2456_v4  ;;  %2140 = vmatprep.mubr.msk.f32.mxu1 %vm2352_vm4, %v2351_v6 }
 0xadd   : > { %2134 = vmatprep.subr.mxu1 %v2351_v6 }
 0xade   : > { %2135 = vmatpush3.msra.mxu1 %v2465_v7 }
 0xadf   : > { %2136 = vmatprep.subr.mxu1 %v2351_v6 }
 0xae0   : > { %2137 = vmatpush3.msra.mxu1 %v2475_v9 }
 0xae1   : > { %2138 = vmatprep.subr.mxu1 %v2351_v6 }
 0xae2   : > { %2139 = vmatpush3.msra.mxu1 %v2488_v12 }
 0xb9b   : > { %v1174_v46 = vpop.f32.mrf.mxu1 }
 0xb9c   : > { %v1199_v48 = vadd.f32 %v1174_v46, %v2528_v16  ;;  %v1179_v54 = vrot.slane %v1174_v46, 4  ;;  %v1180_v55 = vrot.slane %v1174_v46, 5 }
 0xb9d   : > { %v2120_v49 = vpop.f32.mrf.mxu1 }
 0xb9e   : > { %v1202_v52 = vrot.slane %v1199_v48, 5  ;;  %v1201_v53 = vrot.slane %v1199_v48, 4  ;;  %v1183_v56 = vadd.f32 %v1179_v54, %v2539_v23  ;;  %v1184_v57 = vadd.f32 %v2537_v22, %v1180_v55 }
 0xba0   : > { %1205 = vrot.lane.b32.xlu1 %v1202_v52, %s2353_s26  ;;  %1203 = vrot.lane.b32.xlu0 %v1201_v53, %s2353_s26  ;;  %v1185_v59 = vadd.f32 %v2545_v26, %v1183_v56  ;;  %v1186_v60 = vadd.f32 %v2545_v26, %v1184_v57 }
 0xba2   : > { %v1982_v61 = vmul.f32 -1.442695, %v1185_v59  ;;  %v1983_v62 = vmul.f32 -1.442695, %v1186_v60 }
 0xba4   : > { %2250 = vpow2.f32 %v1982_v61 }
 0xba5   : > { %2252 = vpow2.f32 %v1983_v62 }
 0xbb1   : > { %v2251_v63 = vpop.eup %2250 }
 0xbb2   : > { %v2253_v1 = vpop.eup %2252  ;;  %v1193_v2 = vadd.f32 1.0, %v2251_v63 }
 0xbb3   : > { %v1194_v3 = vadd.f32 1.0, %v2253_v1 }
 0xbb4   : > { %2254 = vrcp.f32 %v1193_v2 }
 0xbb5   : > { %2256 = vrcp.f32 %v1194_v3 }
 0xbc1   : > { %v2255_v5 = vpop.eup %2254 }
 0xbc2   : > { %v2257_v8 = vpop.eup %2256  ;;  %v1223_v28 = vsub.f32 1.0, %v2255_v5  ;;  %v1239_v33 = vmul.f32 %v2255_v5, %v1235_v29 }
 0xbc3   : > { %v1224_v24 = vsub.f32 1.0, %v2257_v8  ;;  %v1240_v30 = vmul.f32 %v2257_v8, %v1236_v25 }
 0xc12   : > { %v1206_v10 = vpop.permute.xlu1 %1205  ;;  %v1204_v11 = vpop.permute.xlu0 %1203 }
 0xc13   : > { %v1210_v13 = vmul.f32 %v2257_v8, %v1206_v10  ;;  %v1209_v14 = vmul.f32 %v2255_v5, %v1204_v11 }
 0xc15   : > { %1215 = vrot.lane.b32.xlu1 %v1210_v13, %s2353_s26  ;;  %1213 = vrot.lane.b32.xlu0 %v1209_v14, %s2353_s26 }
 0xc87   : > { %v1216_v15 = vpop.permute.xlu1 %1215  ;;  %v1214_v17 = vpop.permute.xlu0 %1213 }
 0xc88   : > { %v1220_v18 = vadd.f32 %v1216_v15, %v2555_v44  ;;  %v1219_v19 = vadd.f32 %v1214_v17, %v2558_v47 }
 0xc8a   : > { %2258 = vtanh.f32 %v1220_v18 }
 0xc8b   : > { %2260 = vtanh.f32 %v1219_v19 }
 0xc97   : > { %v2259_v20 = vpop.eup %2258 }
 0xc98   : > { %v2261_v21 = vpop.eup %2260  ;;  %1229 = vrot.lane.b32.xlu1 %v2259_v20, %s2355_s22 }
 0xc99   : > { %1227 = vrot.lane.b32.xlu0 %v2261_v21, %s2355_s22 }
 0xd0a   : > { %v1230_v27 = vpop.permute.xlu1 %1229 }
 0xd0b   : > { %v1234_v31 = vmul.f32 %v1230_v27, %v1224_v24  ;;  %v1228_v32 = vpop.permute.xlu0 %1227 }
 0xd0c   : > { %v1233_v34 = vmul.f32 %v1228_v32, %v1223_v28 }
 0xd0d   : > { %v2698_v35 = vadd.f32 %v1240_v30, %v1234_v31 }
 0xd0e   : > { %v2700_v36 = vadd.f32 %v1239_v33, %v1233_v34 }
 0xd0f   : > { %v1255_v39 = vrot.slane %v2698_v35, 3  ;;  %v1389_v18 = vrot.slane %v2698_v35, 7 }
 0xd10   : > { %v1254_v40 = vrot.slane %v2700_v36, 4  ;;  %v1388_v21 = vrot.slane %v2700_v36, 7 }
 0xd12   : > { %v1256_v43 = vsel %vm647_vm5, %v1255_v39, %v1254_v40 }
 0xd13   : > { %1257 = vrot.lane.b32.xlu0 %v1256_v43, %s2355_s22 }
 0xd85   : > { %v1258_v45 = vpop.permute.xlu0 %1257 }
 0xd86   : > { %2130 = vmatmul.mubr.msk.f32.vlgmr.msra.gmra.mxu0 %vm487_vm3, %v1258_v45 }
 0xd87   : > { %2144 = vmatpush3.msra.mxu0 %v2456_v4  ;;  %2151 = vmatprep.mubr.msk.f32.mxu0 %vm2352_vm4, %v2351_v6 }
 0xd88   : > { %2145 = vmatprep.subr.mxu0 %v2351_v6 }
 0xd89   : > { %2146 = vmatpush3.msra.mxu0 %v2465_v7 }
 0xd8a   : > { %2147 = vmatprep.subr.mxu0 %v2351_v6 }
 0xd8b   : > { %2148 = vmatpush3.msra.mxu0 %v2475_v9 }
 0xd8c   : > { %2149 = vmatprep.subr.mxu0 %v2351_v6 }
 0xd8d   : > { %2150 = vmatpush3.msra.mxu0 %v2488_v12 }
 0xe46   : > { %v1327_v46 = vpop.f32.mrf.mxu0 }
 0xe47   : > { %v1352_v48 = vadd.f32 %v1327_v46, %v2528_v16  ;;  %v1332_v53 = vrot.slane %v1327_v46, 3  ;;  %v1333_v7 = vrot.slane %v1327_v46, 4 }
 0xe48   : > { %v2131_v49 = vpop.f32.mrf.mxu0 }
 0xe49   : > { %v1355_v4 = vrot.slane %v1352_v48, 4  ;;  %v1354_v52 = vrot.slane %v1352_v48, 3  ;;  %v1336_v54 = vadd.f32 %v1332_v53, %v2539_v23  ;;  %v1337_v9 = vadd.f32 %v2537_v22, %v1333_v7 }
 0xe4b   : > { %1358 = vrot.lane.b32.xlu0 %v1355_v4, %s2353_s26  ;;  %1356 = vrot.lane.b32.xlu1 %v1354_v52, %s2353_s26  ;;  %v1338_v6 = vadd.f32 %v2545_v26, %v1336_v54  ;;  %v1339_v12 = vadd.f32 %v2545_v26, %v1337_v9 }
 0xe4d   : > { %v1985_v55 = vmul.f32 -1.442695, %v1338_v6  ;;  %v1986_v56 = vmul.f32 -1.442695, %v1339_v12 }
 0xe4f   : > { %2262 = vpow2.f32 %v1985_v55 }
 0xe50   : > { %2264 = vpow2.f32 %v1986_v56 }
 0xe5c   : > { %v2263_v57 = vpop.eup %2262 }
 0xe5d   : > { %v2265_v59 = vpop.eup %2264  ;;  %v1346_v60 = vadd.f32 1.0, %v2263_v57 }
 0xe5e   : > { %v1347_v61 = vadd.f32 1.0, %v2265_v59 }
 0xe5f   : > { %2266 = vrcp.f32 %v1346_v60 }
 0xe60   : > { %2268 = vrcp.f32 %v1347_v61 }
 0xe6c   : > { %v2267_v62 = vpop.eup %2266 }
 0xe6d   : > { %v2269_v63 = vpop.eup %2268  ;;  %v1376_v20 = vsub.f32 1.0, %v2267_v62  ;;  %v1392_v28 = vmul.f32 %v2267_v62, %v1388_v21 }
 0xe6e   : > { %v1377_v17 = vsub.f32 1.0, %v2269_v63  ;;  %v1393_v24 = vmul.f32 %v2269_v63, %v1389_v18 }
 0xebd   : > { %v1359_v1 = vpop.permute.xlu0 %1358  ;;  %v1357_v2 = vpop.permute.xlu1 %1356 }
 0xebe   : > { %v1363_v3 = vmul.f32 %v2269_v63, %v1359_v1  ;;  %v1362_v5 = vmul.f32 %v2267_v62, %v1357_v2 }
 0xec0   : > { %1368 = vrot.lane.b32.xlu0 %v1363_v3, %s2353_s26  ;;  %1366 = vrot.lane.b32.xlu1 %v1362_v5, %s2353_s26 }
 0xf32   : > { %v1369_v8 = vpop.permute.xlu0 %1368  ;;  %v1367_v10 = vpop.permute.xlu1 %1366 }
 0xf33   : > { %v1373_v11 = vadd.f32 %v1369_v8, %v2555_v44  ;;  %v1372_v13 = vadd.f32 %v1367_v10, %v2558_v47 }
 0xf35   : > { %2270 = vtanh.f32 %v1373_v11 }
 0xf36   : > { %2272 = vtanh.f32 %v1372_v13 }
 0xf42   : > { %v2271_v14 = vpop.eup %2270 }
 0xf43   : > { %v2273_v15 = vpop.eup %2272  ;;  %1382 = vrot.lane.b32.xlu0 %v2271_v14, %s2355_s22 }
 0xf44   : > { %1380 = vrot.lane.b32.xlu1 %v2273_v15, %s2355_s22 }
 0xfb5   : > { %v1383_v19 = vpop.permute.xlu0 %1382 }
 0xfb6   : > { %v1387_v25 = vmul.f32 %v1383_v19, %v1377_v17  ;;  %v1381_v27 = vpop.permute.xlu1 %1380 }
 0xfb7   : > { %v1386_v29 = vmul.f32 %v1381_v27, %v1376_v20 }
 0xfb8   : > { %v2731_v30 = vadd.f32 %v1393_v24, %v1387_v25 }
 0xfb9   : > { %v2733_v31 = vadd.f32 %v1392_v28, %v1386_v29 }
 0xfba   : > { %v1408_v32 = vrot.slane %v2731_v30, 4  ;;  %v1542_v14 = vrot.slane %v2731_v30, 7 }
 0xfbb   : > { %v1407_v33 = vrot.slane %v2733_v31, 5  ;;  %v1541_v18 = vrot.slane %v2733_v31, 7 }
 0xfbd   : > { %v1409_v34 = vsel %vm647_vm5, %v1408_v32, %v1407_v33 }
 0xfbe   : > { %1410 = vrot.lane.b32.xlu1 %v1409_v34, %s2355_s22 }
0x1030   : > { %v1411_v39 = vpop.permute.xlu1 %1410 }
0x1031   : > { %2141 = vmatmul.mubr.msk.f32.vlgmr.msra.gmra.mxu1 %vm487_vm3, %v1411_v39 }
0x10f1   : > { %v1480_v40 = vpop.f32.mrf.mxu1 }
0x10f2   : > { %v1505_v43 = vadd.f32 %v1480_v40, %v2528_v16  ;;  %v1485_v49 = vrot.slane %v1480_v40, 2  ;;  %v1486_v4 = vrot.slane %v1480_v40, 3 }
0x10f3   : > { %v2142_v45 = vpop.f32.mrf.mxu1 }
0x10f4   : > { %v1508_v46 = vrot.slane %v1505_v43, 3  ;;  %v1507_v48 = vrot.slane %v1505_v43, 2  ;;  %v1489_v52 = vadd.f32 %v1485_v49, %v2539_v23  ;;  %v1490_v53 = vadd.f32 %v2537_v22, %v1486_v4 }
0x10f6   : > { %1511 = vrot.lane.b32.xlu1 %v1508_v46, %s2353_s26  ;;  %1509 = vrot.lane.b32.xlu0 %v1507_v48, %s2353_s26  ;;  %v1491_v7 = vadd.f32 %v2545_v26, %v1489_v52  ;;  %v1492_v54 = vadd.f32 %v2545_v26, %v1490_v53 }
0x10f8   : > { %v1988_v9 = vmul.f32 -1.442695, %v1491_v7  ;;  %v1989_v6 = vmul.f32 -1.442695, %v1492_v54 }
0x10fa   : > { %2274 = vpow2.f32 %v1988_v9 }
0x10fb   : > { %2276 = vpow2.f32 %v1989_v6 }
0x1107   : > { %v2275_v12 = vpop.eup %2274 }
0x1108   : > { %v2277_v55 = vpop.eup %2276  ;;  %v1499_v56 = vadd.f32 1.0, %v2275_v12 }
0x1109   : > { %v1500_v57 = vadd.f32 1.0, %v2277_v55 }
0x110a   : > { %2278 = vrcp.f32 %v1499_v56 }
0x110b   : > { %2280 = vrcp.f32 %v1500_v57 }
0x1117   : > { %v2279_v59 = vpop.eup %2278 }
0x1118   : > { %v2281_v60 = vpop.eup %2280  ;;  %v1529_v17 = vsub.f32 1.0, %v2279_v59  ;;  %v1545_v24 = vmul.f32 %v2279_v59, %v1541_v18 }
0x1119   : > { %v1530_v13 = vsub.f32 1.0, %v2281_v60  ;;  %v1546_v19 = vmul.f32 %v2281_v60, %v1542_v14 }
0x1168   : > { %v1512_v61 = vpop.permute.xlu1 %1511  ;;  %v1510_v62 = vpop.permute.xlu0 %1509 }
0x1169   : > { %v1516_v63 = vmul.f32 %v2281_v60, %v1512_v61  ;;  %v1515_v1 = vmul.f32 %v2279_v59, %v1510_v62 }
0x116b   : > { %1521 = vrot.lane.b32.xlu1 %v1516_v63, %s2353_s26  ;;  %1519 = vrot.lane.b32.xlu0 %v1515_v1, %s2353_s26 }
0x11dd   : > { %v1522_v2 = vpop.permute.xlu1 %1521  ;;  %v1520_v3 = vpop.permute.xlu0 %1519 }
0x11de   : > { %v1526_v5 = vadd.f32 %v1522_v2, %v2555_v44  ;;  %v1525_v8 = vadd.f32 %v1520_v3, %v2558_v47 }
0x11e0   : > { %2282 = vtanh.f32 %v1526_v5 }
0x11e1   : > { %2284 = vtanh.f32 %v1525_v8 }
0x11ed   : > { %v2283_v10 = vpop.eup %2282 }
0x11ee   : > { %v2285_v11 = vpop.eup %2284  ;;  %1535 = vrot.lane.b32.xlu1 %v2283_v10, %s2355_s22 }
0x11ef   : > { %1533 = vrot.lane.b32.xlu0 %v2285_v11, %s2355_s22 }
0x1260   : > { %v1536_v15 = vpop.permute.xlu1 %1535 }
0x1261   : > { %v1540_v20 = vmul.f32 %v1536_v15, %v1530_v13  ;;  %v1534_v21 = vpop.permute.xlu0 %1533 }
0x1262   : > { %v1539_v25 = vmul.f32 %v1534_v21, %v1529_v17 }
0x1263   : > { %v2755_v27 = vadd.f32 %v1546_v19, %v1540_v20 }
0x1264   : > { %v2757_v28 = vadd.f32 %v1545_v24, %v1539_v25 }
0x1265   : > { %v1561_v29 = vrot.slane %v2755_v27, 5 }
0x1266   : > { %v1560_v32 = vrot.slane %v2757_v28, 6 }
0x1268   : > { %v1562_v33 = vsel %vm647_vm5, %v1561_v29, %v1560_v32 }
0x1269   : > { %1563 = vrot.lane.b32.xlu0 %v1562_v33, %s2355_s22 }
0x12db   : > { %v1564_v34 = vpop.permute.xlu0 %1563 }
0x12dc   : > { %2152 = vmatmul.mubr.msk.f32.vlgmr.msra.gmra.mxu0 %vm487_vm3, %v1564_v34 }
0x139c   : > { %v1633_v39 = vpop.f32.mrf.mxu0 }
0x139d   : > { %v1658_v40 = vadd.f32 %v1633_v39, %v2528_v16  ;;  %v1638_v48 = vrot.slane %v1633_v39, 1  ;;  %v1639_v49 = vrot.slane %v1633_v39, 2 }
0x139e   : > { %v2153_v43 = vpop.f32.mrf.mxu0 }
0x139f   : > { %v1661_v45 = vrot.slane %v1658_v40, 2  ;;  %v1660_v46 = vrot.slane %v1658_v40, 1  ;;  %v1642_v4 = vadd.f32 %v1638_v48, %v2539_v23  ;;  %v1643_v52 = vadd.f32 %v2537_v22, %v1639_v49 }
0x13a1   : > { %1664 = vrot.lane.b32.xlu1 %v1661_v45, %s2353_s26  ;;  %1662 = vrot.lane.b32.xlu0 %v1660_v46, %s2353_s26  ;;  %v1644_v53 = vadd.f32 %v2545_v26, %v1642_v4  ;;  %v1645_v7 = vadd.f32 %v2545_v26, %v1643_v52 }
0x13a3   : > { %v1991_v54 = vmul.f32 -1.442695, %v1644_v53  ;;  %v1992_v9 = vmul.f32 -1.442695, %v1645_v7 }
0x13a5   : > { %2286 = vpow2.f32 %v1991_v54 }
0x13a6   : > { %2288 = vpow2.f32 %v1992_v9 }
0x13b2   : > { %v2287_v16 = vpop.eup %2286 }
0x13b3   : > { %v2289_v6 = vpop.eup %2288  ;;  %v1652_v12 = vadd.f32 1.0, %v2287_v16 }
0x13b4   : > { %v1653_v55 = vadd.f32 1.0, %v2289_v6 }
0x13b5   : > { %2290 = vrcp.f32 %v1652_v12 }
0x13b6   : > { %2292 = vrcp.f32 %v1653_v55 }
0x13c2   : > { %v2291_v56 = vpop.eup %2290 }
0x13c3   : > { %v2293_v57 = vpop.eup %2292 }
0x1413   : > { %v1665_v59 = vpop.permute.xlu1 %1664  ;;  %v1663_v23 = vpop.permute.xlu0 %1662 }
0x1414   : > { %v1669_v60 = vmul.f32 %v2293_v57, %v1665_v59  ;;  %v1668_v22 = vmul.f32 %v2291_v56, %v1663_v23 }
0x1416   : > { %1674 = vrot.lane.b32.xlu1 %v1669_v60, %s2353_s26  ;;  %1672 = vrot.lane.b32.xlu0 %v1668_v22, %s2353_s26 }
0x1488   : > { %v1675_v26 = vpop.permute.xlu1 %1674  ;;  %v1673_v61 = vpop.permute.xlu0 %1672 }
0x1489   : > { %v1679_v62 = vadd.f32 %v1675_v26, %v2555_v44  ;;  %v1678_v63 = vadd.f32 %v1673_v61, %v2558_v47  ;;  %v1683_v44 = vsub.f32 1.0, %v2293_v57  ;;  %v1695_v47 = vrot.slane %v2755_v27, 7 }
0x148b   : > { %2294 = vtanh.f32 %v1679_v62 }
0x148c   : > { %2296 = vtanh.f32 %v1678_v63 }
0x1498   : > { %v2295_v1 = vpop.eup %2294 }
0x1499   : > { %v2297_v2 = vpop.eup %2296  ;;  %1688 = vrot.lane.b32.xlu1 %v2295_v1, %s2355_s22 }
0x149a   : > { %1686 = vrot.lane.b32.xlu0 %v2297_v2, %s2355_s22 }
0x149d   : > { %637 = vrot.lane.b32.xlu1 %v2567_v0, %s2355_s22  ;;  %v1682_v0 = vsub.f32 1.0, %v2291_v56 }
0x149e   : > { %639 = vrot.lane.b32.xlu0 %v2564_v58, %s2355_s22 }
0x14a1   : > { %787 = vrot.lane.b32.xlu1 %v2597_v50, %s2355_s22  ;;  %v1694_v50 = vrot.slane %v2757_v28, 7 }
0x14a2   : > { %789 = vrot.lane.b32.xlu0 %v2599_v51, %s2355_s22  ;;  %v1699_v51 = vmul.f32 %v2293_v57, %v1695_v47 }
0x14a5   : > { %939 = vrot.lane.b32.xlu1 %v2633_v42, %s2355_s22 }
0x14a6   : > { %941 = vrot.lane.b32.xlu0 %v2631_v41, %s2355_s22 }
0x14a9   : > { %1092 = vrot.lane.b32.xlu1 %v2667_v38, %s2355_s22 }
0x14aa   : > { %1094 = vrot.lane.b32.xlu0 %v2665_v37, %s2355_s22  ;;  %v1698_v37 = vmul.f32 %v2291_v56, %v1694_v50 }
0x14ad   : > { %1245 = vrot.lane.b32.xlu1 %v2700_v36, %s2355_s22 }
0x14ae   : > { %1247 = vrot.lane.b32.xlu0 %v2698_v35, %s2355_s22 }
0x14b1   : > { %1398 = vrot.lane.b32.xlu1 %v2733_v31, %s2355_s22 }
0x14b2   : > { %1400 = vrot.lane.b32.xlu0 %v2731_v30, %s2355_s22 }
0x14b5   : > { %1551 = vrot.lane.b32.xlu1 %v2757_v28, %s2355_s22 }
0x14b6   : > { %1553 = vrot.lane.b32.xlu0 %v2755_v27, %s2355_s22 }
0x150b   : > { %v1689_v58 = vpop.permute.xlu1 %1688 }
0x150c   : > { %v1693_v41 = vmul.f32 %v1689_v58, %v1683_v44  ;;  %v1687_v42 = vpop.permute.xlu0 %1686 }
0x150d   : > { %v1692_v38 = vmul.f32 %v1687_v42, %v1682_v0 }
0x150e   : > { %v1701_v35 = vadd.f32 %v1699_v51, %v1693_v41 }
0x150f   : > { %v1700_v36 = vadd.f32 %v1698_v37, %v1692_v38  ;;  %v638_v30 = vpop.permute.xlu1 %637 }
0x1510   : > { %644 = vst.msk [vmem:[#allocation3] sm:$0x1] %vm643_vm6, %v638_v30  ;;  %v640_v31 = vpop.permute.xlu0 %639  ;;  %1706 = vrot.lane.b32.xlu0 %v1701_v35, %s2355_s22  ;;  %v1713_v5 = vrot.slane %v1701_v35, 7 }
0x1511   : > { %645 = vst.msk [vmem:[#allocation3 + $0x8] sm:$0x1] %vm643_vm6, %v640_v31  ;;  %1704 = vrot.lane.b32.xlu1 %v1700_v36, %s2355_s22 }
0x1513   : > { %v788_v3 = vpop.permute.xlu1 %787 }
0x1514   : > { %794 = vst.msk [vmem:[#allocation3] sm:$0x2] %vm793_vm7, %v788_v3  ;;  %v790_v8 = vpop.permute.xlu0 %789 }
0x1515   : > { %795 = vst.msk [vmem:[#allocation3 + $0x8] sm:$0x2] %vm793_vm7, %v790_v8  ;;  %1714 = vrot.lane.b32.xlu1 %v1713_v5, %s2355_s22 }
0x1517   : > { %v940_v10 = vpop.permute.xlu1 %939 }
0x1518   : > { %946 = vst.msk [vmem:[#allocation3] sm:$0x4] %vm945_vm8, %v940_v10  ;;  %v942_v11 = vpop.permute.xlu0 %941 }
0x1519   : > { %947 = vst.msk [vmem:[#allocation3 + $0x8] sm:$0x4] %vm945_vm8, %v942_v11 }
0x151b   : > { %v1093_v13 = vpop.permute.xlu1 %1092 }
0x151c   : > { %1099 = vst.msk [vmem:[#allocation3] sm:$0x8] %vm1098_vm9, %v1093_v13  ;;  %v1095_v14 = vpop.permute.xlu0 %1094 }
0x151d   : > { %1100 = vst.msk [vmem:[#allocation3 + $0x8] sm:$0x8] %vm1098_vm9, %v1095_v14 }
0x151f   : > { %v1246_v15 = vpop.permute.xlu1 %1245 }
0x1520   : > { %1252 = vst.msk [vmem:[#allocation3] sm:$0x10] %vm1251_vm10, %v1246_v15  ;;  %v1248_v17 = vpop.permute.xlu0 %1247 }
0x1521   : > { %1253 = vst.msk [vmem:[#allocation3 + $0x8] sm:$0x10] %vm1251_vm10, %v1248_v17 }
0x1523   : > { %v1399_v18 = vpop.permute.xlu1 %1398 }
0x1524   : > { %1405 = vst.msk [vmem:[#allocation3] sm:$0x20] %vm1404_vm11, %v1399_v18  ;;  %v1401_v19 = vpop.permute.xlu0 %1400 }
0x1525   : > { %1406 = vst.msk [vmem:[#allocation3 + $0x8] sm:$0x20] %vm1404_vm11, %v1401_v19 }
0x1527   : > { %v1552_v20 = vpop.permute.xlu1 %1551 }
0x1528   : > { %1558 = vst.msk [vmem:[#allocation3] sm:$0x40] %vm1557_vm12, %v1552_v20  ;;  %v1554_v21 = vpop.permute.xlu0 %1553 }
0x1529   : > { %1559 = vst.msk [vmem:[#allocation3 + $0x8] sm:$0x40] %vm1557_vm12, %v1554_v21 }
0x1582   : > { %v1707_v24 = vpop.permute.xlu0 %1706 }
0x1583   : > { %v1705_v25 = vpop.permute.xlu1 %1704  ;;  %1712 = vst.msk [vmem:[#allocation3 + $0x8] sm:$0x80] %vm1710_vm13, %v1707_v24 }
0x1584   : > { %1711 = vst.msk [vmem:[#allocation3] sm:$0x80] %vm1710_vm13, %v1705_v25  ;;  %1717 = vst.msk [vmem:[#allocation2 - $0x7] sm:$0x80] %vm1710_vm13, %v1705_v25  ;;  %1722 = sbr.rel (%p1993_p11) target bundleno = 5515 (0x158b), region = 98 }
0x1587   : > { %v1715_v27 = vpop.permute.xlu1 %1714 }
0x1588   : > { %1718 = vst.msk [vmem:[#allocation2 + $0x1] sm:$0x1] %vm643_vm6, %v1715_v27 }
0x1589   : > { %1723 = vst.msk [vmem:[#allocation6 - $0x7] sm:$0x80] %vm1710_vm13, %v1705_v25 }
0x158a   : > { %1724 = vst.msk [vmem:[#allocation6 + $0x1] sm:$0x1] %vm643_vm6, %v1715_v27 }
0x158b PF: > { %v1730_v28 = vld [vmem:[%s2871_s6 + $0x18] sm:$0xff]  ;;  %v1729_v29 = vld [vmem:[%s2871_s6 + $0x10] sm:$0xff]  ;;  %v1728_v33 = vld [vmem:[%s2871_s6 + $0x8] sm:$0xff]  ;;  %s1998_s18 = sshll.u32 (%p2434_p5), %s2420_s12, 3 }
0x158c   : > { %2154 = vmatprep.subr.mxu1 %v1730_v28  ;;  %v1727_v34 = vld [vmem:[%s2871_s6] sm:$0xff]  ;;  %v1726_v39 = vld [vmem:[#allocation3 + $0x8] sm:$0xff]  ;;  %s1835_s21 = scalar_lea.vmem (%p2434_p5), %s2873_s8, %s1998_s18 }
0x158d   : > { %v1725_v32 = vld [vmem:[#allocation3] sm:$0xff]  ;;  %2155 = vmatpush3.msra.mxu1 %v1730_v28  ;;  %v1994_v40 = vld [vmem:[%s2872_s7] ss:$0 sm:$0xff] }
0x158e   : > { %2162 = vmatprep.mubr.msk.f32.mxu1 %vm487_vm3, %v1725_v32  ;;  %2156 = vmatprep.subr.mxu1 %v1729_v29 }
0x158f   : > { %2157 = vmatpush3.msra.mxu1 %v1729_v29 }
0x1590   : > { %2158 = vmatprep.subr.mxu1 %v1728_v33 }
0x1591   : > { %2159 = vmatpush3.msra.mxu1 %v1728_v33 }
0x1592   : > { %2160 = vmatprep.subr.mxu1 %v1727_v34 }
0x1593   : > { %2161 = vmatpush3.msra.mxu1 %v1727_v34 }
0x1594   : > { %2163 = vmatmul.mubr.msk.f32.vlgmr.msra.gmra.mxu1 %vm487_vm3, %v1726_v39 }
0x1654   : > { %v2164_v43 = vpop.f32.mrf.mxu1 }
0x1655   : > { %v1816_v45 = vadd.f32 %v2164_v43, %v1994_v40 }
0x1656   : > { %v1810_v46 = vpop.f32.mrf.mxu1 }
0x1657   : > { %vm1820_vm14 = vcmp.ge.f32.partialorder %v1816_v45, 0.0  ;;  %v1822_v48 = vmul.f32 0.01, %v1816_v45  ;;  %v1811_v49 = vadd.f32 %v1994_v40, %v1810_v46 }
0x1658   : > { %1833 = sbr.rel (!%p2434_p5) target bundleno = 5733 (0x1665), region = 102 }
0x1659   : > { %v1824_v4 = vsel %vm1820_vm14, %v1816_v45, %v1822_v48  ;;  %vm1819_vm15 = vcmp.ge.f32.partialorder %v1811_v49, 0.0  ;;  %v1821_v52 = vmul.f32 0.01, %v1811_v49 }
0x165a   : > { %1826 = vst.msk [vmem:[%s2447_s28 + $0x8] sm:$0xff] %vm400_vm2, %v1824_v4 }
0x165b   : > { %v1823_v53 = vsel %vm1819_vm15, %v1811_v49, %v1821_v52 }
0x165c   : > { %1825 = vst.msk [vmem:[%s2447_s28] sm:$0xff] %vm400_vm2, %v1823_v53 }
0x1661   : > { %v1868_v54 = vld [vmem:[%s2447_s28 + $0x8] sm:$0xff] }
0x1662   : > { %1869 = vst [vmem:[%s1835_s21 + $0x20] sm:$0xff] %v1868_v54 }
0x1663   : > { %v1866_v7 = vld [vmem:[%s2447_s28] sm:$0xff] }
0x1664   : > { %1867 = vst [vmem:[%s1835_s21] sm:$0xff] %v1866_v7 }
0x1665 PF: > { %s2356_s22 = smov [#allocation6]  }
0x1666   : > { %s1880_s23 = sshll.u32 %s2356_s22, 4  ;;  %s1881_s23 = int_to_ptr.vmem [resolvable:$true] %s1880_s23 }
0x1667   : > { %s2298_s24 = scalar_lea.vmem %s1881_s23, 32  ;;  %p2305_p1 = scmp.lt.s32.totalorder %s1881_s23, %s1881_s23 }
0x1668   : > { %p2299_p12 = scmp.ne.s32.totalorder %s1881_s23, %s2298_s24  ;;  %p2306_p2 = scmp.lt.s32.totalorder %s2298_s24, %s2298_s24 }
0x166a   : > { %p2300_p13 = pnand %p2299_p12, %p212_p3  ;;  %p2307_p4 = por %p2306_p2, %p2305_p1 }
0x166c   : > { %p2301_p0 = pneg %p2300_p13 }
0x166e   : > { %p2308_p5 = pnand %p2307_p4, %p2301_p0 }
0x1670   : > { %2311 = shalt.err (!%p2308_p5)
}
0x1671   : > { %2166 = dma.vmem_to_hbm [thread:$0]  (%p212_p3), %s1881_s23, 32, %s2874_s9, [#allocation7]  }
0x1672   : > { %2335 = dma.done.wait (%p212_p3), [#allocation7], 32  }
0x1673   : > { %2337 = vsyncadd (%p212_p3), [#allocation7], 4294967264 }
0x1674 PF: > { %p18_p6 = scmp.ge.s32.totalorder %s2422_s13, 6   ;;  %s2876_s30 = smov %s2344_s10 }
0x1675   : > { %s2877_s10 = smov %s2430_s16  ;;  %s2878_s11 = smov %s2422_s13 }
0x1676   :  { %20 = sbr.rel (!%p18_p6) target bundleno = 2 (0x2), region = 180 }
0x167b   :  { %1900 = vsyncpa [#allocation7], 1 }
0x167c   :  { %1902 = vsyncpa [#allocation7 + $0x1], 1 }

</bundles_post_ra>
